<compile_context>
chip_gen: v7x
topology: tpu7x:2x2x1
jax: 0.10.0
libtpu: 0.0.40
codegen_flags: <defaults>
</compile_context>

<pallas_src>
from functools import partial

import jax
import jax.numpy as jnp
from jax.experimental import pallas as pl
from jax.experimental.pallas import tpu as pltpu


def _round_up(x: int, m: int) -> int:
    return ((x + m - 1) // m) * m


def _pick_seq_tile(s: int, cap: int) -> int:
    """Largest tile <= cap (multiple of 8) that keeps padding waste modest."""
    t = min(cap, _round_up(s, 8))
    while t > 128 and (_round_up(s, t) - s) * 4 > t:
        t //= 2
    return t


# ------------------------------------------------------------------ linear --
def _linear_bias_kernel(x_ref, w_ref, b_ref, o_ref):
    # Single reduction step: full K is resident, no accumulator scratch needed.
    o_ref[...] = (jnp.dot(x_ref[...], w_ref[...],
                          preferred_element_type=jnp.float32)
                  + b_ref[...]).astype(o_ref.dtype)


def _linear_bias_kernel_ktiled(x_ref, w_ref, b_ref, o_ref, acc_ref):
    # Fallback when K does not fit a single tile (not hit by Molmo ViT shapes).
    k = pl.program_id(2)

    @pl.when(k == 0)
    def _():
        acc_ref[...] = jnp.zeros_like(acc_ref)

    acc_ref[...] += jnp.dot(x_ref[...], w_ref[...],
                            preferred_element_type=jnp.float32)

    @pl.when(k == pl.num_programs(2) - 1)
    def _():
        o_ref[...] = (acc_ref[...] + b_ref[...]).astype(o_ref.dtype)


def pallas_linear(x, w, b, *, out_dtype=None, tm=512, tn=512, tk_max=1024):
    """out = x @ w + b.  x: [T, K], w: [K, N], b: [N].

    bf16 MXU operands, f32 accumulation, `out_dtype` output (default x.dtype).
    """
    T, K = x.shape
    Kw, N = w.shape
    assert K == Kw and b.shape == (N,)
    out_dtype = out_dtype or x.dtype

    x = x.astype(jnp.bfloat16)
    w = w.astype(jnp.bfloat16)
    b = b.astype(jnp.float32)

    tm = _pick_seq_tile(T, tm)
    tn = min(tn, _round_up(N, 128))
    single_k = K <= tk_max
    tk = _round_up(K, 128) if single_k else tk_max

    T_p, K_p, N_p = _round_up(T, tm), _round_up(K, tk), _round_up(N, tn)
    if (T_p, K_p) != (T, K):
        x = jnp.pad(x, ((0, T_p - T), (0, K_p - K)))
    if (K_p, N_p) != (K, N):
        w = jnp.pad(w, ((0, K_p - K), (0, N_p - N)))
    if N_p != N:
        b = jnp.pad(b, (0, N_p - N))
    b = b.reshape(1, N_p)

    if single_k:
        out = pl.pallas_call(
            _linear_bias_kernel,
            out_shape=jax.ShapeDtypeStruct((T_p, N_p), out_dtype),
            grid_spec=pltpu.PrefetchScalarGridSpec(
                num_scalar_prefetch=0,
                grid=(T_p // tm, N_p // tn),
                in_specs=[
                    pl.BlockSpec((tm, K_p), lambda i, j: (i, 0)),   # x tile
                    pl.BlockSpec((K_p, tn), lambda i, j: (0, j)),   # w tile
                    pl.BlockSpec((1, tn), lambda i, j: (0, j)),     # bias tile
                ],
                out_specs=pl.BlockSpec((tm, tn), lambda i, j: (i, j)),
            ),
            compiler_params=pltpu.CompilerParams(
                dimension_semantics=("parallel", "parallel")),
        )(x, w, b)
    else:
        out = pl.pallas_call(
            _linear_bias_kernel_ktiled,
            out_shape=jax.ShapeDtypeStruct((T_p, N_p), out_dtype),
            grid_spec=pltpu.PrefetchScalarGridSpec(
                num_scalar_prefetch=0,
                grid=(T_p // tm, N_p // tn, K_p // tk),
                in_specs=[
                    pl.BlockSpec((tm, tk), lambda i, j, k: (i, k)),
                    pl.BlockSpec((tk, tn), lambda i, j, k: (k, j)),
                    pl.BlockSpec((1, tn), lambda i, j, k: (0, j)),
                ],
                out_specs=pl.BlockSpec((tm, tn), lambda i, j, k: (i, j)),
                scratch_shapes=[pltpu.VMEM((tm, tn), jnp.float32)],
            ),
            compiler_params=pltpu.CompilerParams(
                dimension_semantics=("parallel", "parallel", "arbitrary")),
        )(x, w, b)

    if (T_p, N_p) != (T, N):
        out = out[:T, :N]
    return out


# -------------------------------------------------------- flash attention --
def _flash_attn_kernel(q_ref, k_ref, v_ref, o_ref, m_sc, l_sc, acc_sc,
                       *, kv_len, tkv, needs_mask):
    ki = pl.program_id(3)
    last_ki = pl.num_programs(3) - 1

    @pl.when(ki == 0)
    def _():
        m_sc[...] = jnp.full_like(m_sc, -jnp.inf)
        l_sc[...] = jnp.zeros_like(l_sc)
        acc_sc[...] = jnp.zeros_like(acc_sc)

    q = q_ref[...]                        # (hp, tq, dh)  bf16, scale pre-folded
    k = k_ref[...]                        # (hp, tkv, dh) bf16
    v = v_ref[...]                        # (hp, tkv, dh) bf16

    # s[h] = q[h] @ k[h]^T  -- leading-batch MXU matmul, f32 accumulation.
    s = jax.lax.dot_general(q, k, (((2,), (2,)), ((0,), (0,))),
                            preferred_element_type=jnp.float32)   # (hp, tq, tkv)

    if needs_mask:
        # Only the last kv tile contains padded keys; mask only there.
        def _mask(sv):
            kv_ids = ki * tkv + jax.lax.broadcasted_iota(jnp.int32, sv.shape, 2)
            return jnp.where(kv_ids < kv_len, sv, -1e30)
        s = jax.lax.cond(ki == last_ki, _mask, lambda sv: sv, s)

    m_prev = m_sc[...]
    m_new = jnp.maximum(m_prev, s.max(axis=-1, keepdims=True))
    alpha = jnp.exp(m_prev - m_new)
    p = jnp.exp(s - m_new)

    l_sc[...] = alpha * l_sc[...] + p.sum(axis=-1, keepdims=True)
    acc_sc[...] = alpha * acc_sc[...] + jax.lax.dot_general(
        p.astype(v.dtype), v, (((2,), (1,)), ((0,), (0,))),
        preferred_element_type=jnp.float32)
    m_sc[...] = m_new

    @pl.when(ki == last_ki)
    def _():
        inv_l = pl.reciprocal(l_sc[...], approx=True)         # EUP, (hp, tq, 1)
        o = acc_sc[...] * inv_l                               # (hp, tq, dh) f32
        # Lane-dense store: pack the head pair along lanes -> (tq, hp*dh).
        o_ref[...] = jnp.concatenate(
            [o[h] for h in range(o.shape[0])], axis=-1).astype(o_ref.dtype)


def pallas_flash_attention(q, k, v, *, out_dtype=None, tq=512, tkv=512):
    """q, k, v: [B, H, S, dh] (kv already expanded to H heads).

    Returns the attention output as [B, Sq, H*dh] -- lane-dense and already in
    the layout the output projection consumes (no transpose on the way out).
    """
    B, H, Sq, dh = q.shape
    _, Hk, Skv, _ = k.shape
    assert Hk == H and v.shape == k.shape

    q = q.astype(jnp.bfloat16)
    k = k.astype(jnp.bfloat16)
    v = v.astype(jnp.bfloat16)
    out_dtype = out_dtype or jnp.bfloat16

    # Heads per grid step: pair heads so the output block is >=128 lanes wide.
    hp = 2 if (H % 2 == 0 and (2 * dh) % 128 == 0) else H
    # TODO(synk): generic (hp, dh) combos; Molmo ViT always has dh=64, H even.

    tq = _pick_seq_tile(Sq, tq)
    tkv = _pick_seq_tile(Skv, tkv)
    Sq_p, Skv_p = _round_up(Sq, tq), _round_up(Skv, tkv)
    if Sq_p != Sq:
        q = jnp.pad(q, ((0, 0), (0, 0), (0, Sq_p - Sq), (0, 0)))
    if Skv_p != Skv:
        k = jnp.pad(k, ((0, 0), (0, 0), (0, Skv_p - Skv), (0, 0)))
        v = jnp.pad(v, ((0, 0), (0, 0), (0, Skv_p - Skv), (0, 0)))
    needs_mask = Skv_p != Skv

    kernel = partial(_flash_attn_kernel, kv_len=Skv, tkv=tkv,
                     needs_mask=needs_mask)
    out = pl.pallas_call(
        kernel,
        out_shape=jax.ShapeDtypeStruct((B, Sq_p, H * dh), out_dtype),
        grid_spec=pltpu.PrefetchScalarGridSpec(
            num_scalar_prefetch=0,
            grid=(B, H // hp, Sq_p // tq, Skv_p // tkv),
            in_specs=[
                pl.BlockSpec((None, hp, tq, dh),
                             lambda b, g, qi, ki: (b, g, qi, 0)),
                pl.BlockSpec((None, hp, tkv, dh),
                             lambda b, g, qi, ki: (b, g, ki, 0)),
                pl.BlockSpec((None, hp, tkv, dh),
                             lambda b, g, qi, ki: (b, g, ki, 0)),
            ],
            out_specs=pl.BlockSpec((None, tq, hp * dh),
                                   lambda b, g, qi, ki: (b, qi, g)),
            scratch_shapes=[
                pltpu.VMEM((hp, tq, 1), jnp.float32),    # running max
                pltpu.VMEM((hp, tq, 1), jnp.float32),    # running denominator
                pltpu.VMEM((hp, tq, dh), jnp.float32),   # running numerator
            ],
        ),
        compiler_params=pltpu.CompilerParams(
            dimension_semantics=("parallel", "parallel", "parallel",
                                 "arbitrary")),
    )(q, k, v)
    if Sq_p != Sq:
        out = out[:, :Sq, :]
    return out


# ------------------------------------------------------- weight preparation --
def prepare_params(params, *, head_dim, compute_dtype=jnp.bfloat16):
    """One-time weight prep: fuse Q/K/V (and K/V), fold head_dim^-0.5 into
    Wq/bq, cast matmul operands to the MXU compute dtype.  Do this ONCE, not
    per forward call."""
    scale = float(head_dim) ** -0.5
    wq = params["wq"] * scale
    bq = params["bq"] * scale
    f32 = jnp.float32
    return {
        "w_qkv": jnp.concatenate([wq, params["wk"], params["wv"]],
                                 axis=1).astype(compute_dtype),
        "b_qkv": jnp.concatenate([bq, params["bk"], params["bv"]],
                                 axis=0).astype(f32),
        "w_q": wq.astype(compute_dtype),
        "b_q": bq.astype(f32),
        "w_kv": jnp.concatenate([params["wk"], params["wv"]],
                                axis=1).astype(compute_dtype),
        "b_kv": jnp.concatenate([params["bk"], params["bv"]],
                                axis=0).astype(f32),
        "w_o": params["wo"].astype(compute_dtype),
        "b_o": params["bo"].astype(f32),
    }


# ----------------------------------------------------------- full forward --
def multi_head_dot_product_attention(inputs_q, inputs_kv, prepared, *,
                                     num_heads, num_kv_heads, head_dim):
    """Forward pass of Molmo's vision MultiHeadDotProductAttention."""
    self_attention = inputs_kv is None
    if self_attention:
        inputs_kv = inputs_q
    B, Sq, D = inputs_q.shape
    _, Skv, Dk = inputs_kv.shape
    nq = num_heads * head_dim
    nkv = num_kv_heads * head_dim

    if self_attention:
        # Self-attention: single fused Q/K/V matmul (weights pre-fused).
        qkv = pallas_linear(inputs_q.reshape(B * Sq, D), prepared["w_qkv"],
                            prepared["b_qkv"], out_dtype=jnp.bfloat16)
        xq, xk, xv = qkv[:, :nq], qkv[:, nq:nq + nkv], qkv[:, nq + nkv:]
    else:
        xq = pallas_linear(inputs_q.reshape(B * Sq, D), prepared["w_q"],
                           prepared["b_q"], out_dtype=jnp.bfloat16)
        kv = pallas_linear(inputs_kv.reshape(B * Skv, Dk), prepared["w_kv"],
                           prepared["b_kv"], out_dtype=jnp.bfloat16)
        xk, xv = kv[:, :nkv], kv[:, nkv:]

    # [B, S, H, dh] -> [B, H, S, dh] for the per-(head-pair) attention grid.
    # TODO(synk): fold these three transposes away (head axis as grid dim on
    # the [B, S, H, dh] layout requires second-minor size-1 blocks).
    q = xq.reshape(B, Sq, num_heads, head_dim).transpose(0, 2, 1, 3)
    k = xk.reshape(B, Skv, num_kv_heads, head_dim).transpose(0, 2, 1, 3)
    v = xv.reshape(B, Skv, num_kv_heads, head_dim).transpose(0, 2, 1, 3)

    if num_kv_heads != num_heads:
        # TODO(synk): express GQA via the kv index_map (h // rep) instead of
        # materializing; Molmo ViT uses num_kv_heads == num_heads.
        rep = num_heads // num_kv_heads
        k = jnp.repeat(k, rep, axis=1)
        v = jnp.repeat(v, rep, axis=1)

    # Attention output comes back as [B, Sq, H*dh]: lane-dense, and already in
    # the layout the output projection consumes (pure reshape, no transpose).
    o = pallas_flash_attention(q, k, v, out_dtype=jnp.bfloat16)
    out = pallas_linear(o.reshape(B * Sq, nq), prepared["w_o"],
                        prepared["b_o"], out_dtype=inputs_q.dtype)
    return out.reshape(B, Sq, -1)


# --------------------------------------------------------------- reference --
def _reference(inputs_q, inputs_kv, params, *, num_heads, num_kv_heads,
               head_dim):
    if inputs_kv is None:
        inputs_kv = inputs_q
    B, Sq, _ = inputs_q.shape
    _, Skv, _ = inputs_kv.shape
    hp = jax.lax.Precision.HIGHEST

    xq = jnp.dot(inputs_q, params["wq"], precision=hp) + params["bq"]
    xk = jnp.dot(inputs_kv, params["wk"], precision=hp) + params["bk"]
    xv = jnp.dot(inputs_kv, params["wv"], precision=hp) + params["bv"]

    q = xq.reshape(B, Sq, num_heads, head_dim)
    k = xk.reshape(B, Skv, num_kv_heads, head_dim)
    v = xv.reshape(B, Skv, num_kv_heads, head_dim)
    if num_kv_heads != num_heads:
        rep = num_heads // num_kv_heads
        k = jnp.repeat(k, rep, axis=2)
        v = jnp.repeat(v, rep, axis=2)

    scale = float(head_dim) ** -0.5
    s = jnp.einsum("bqhd,bkhd->bhqk", q, k, precision=hp) * scale
    p = jax.nn.softmax(s, axis=-1)
    o = jnp.einsum("bhqk,bkhd->bqhd", p, v, precision=hp)
    o = o.reshape(B, Sq, num_heads * head_dim)
    return jnp.dot(o, params["wo"], precision=hp) + params["bo"]


if __name__ == "__main__":
    # Small ViT-style config (scaled-down VisionBackboneConfig):
    #   image_emb_dim=128, image_num_heads=2, image_num_key_value_heads=2
    hidden_size = 128
    num_heads = 2
    num_kv_heads = 2
    head_dim = hidden_size // num_heads     # 64
    batch = 2
    seq = 77   # not a multiple of 8/128: exercises padding + last-kv-tile mask

    key = jax.random.PRNGKey(0)
    kx, k1, k2, k3, k4, k5, k6, k7, k8 = jax.random.split(key, 9)
    dt = jnp.float32

    def winit(k, fan_in, fan_out):
        return jax.random.normal(k, (fan_in, fan_out), dtype=dt) * (fan_in ** -0.5)

    inputs_q = jax.random.normal(kx, (batch, seq, hidden_size), dtype=dt)
    params = {
        "wq": winit(k1, hidden_size, num_heads * head_dim),
        "bq": jax.random.normal(k2, (num_heads * head_dim,), dtype=dt) * 0.02,
        "wk": winit(k3, hidden_size, num_kv_heads * head_dim),
        "bk": jax.random.normal(k4, (num_kv_heads * head_dim,), dtype=dt) * 0.02,
        "wv": winit(k5, hidden_size, num_kv_heads * head_dim),
        "bv": jax.random.normal(k6, (num_kv_heads * head_dim,), dtype=dt) * 0.02,
        "wo": winit(k7, num_heads * head_dim, hidden_size),
        "bo": jax.random.normal(k8, (hidden_size,), dtype=dt) * 0.02,
    }

    # Weight fusion / scaling / bf16 cast happens once, outside the forward.
    prepared = prepare_params(params, head_dim=head_dim)

    fwd = jax.jit(partial(multi_head_dot_product_attention,
                          num_heads=num_heads, num_kv_heads=num_kv_heads,
                          head_dim=head_dim))
    out = jax.block_until_ready(fwd(inputs_q, None, prepared))

    ref = _reference(inputs_q, None, params,
                     num_heads=num_heads, num_kv_heads=num_kv_heads,
                     head_dim=head_dim)

    assert out.shape == (batch, seq, hidden_size), out.shape
    max_err = float(jnp.max(jnp.abs(out - ref)))
    # bf16 MXU operands (vs. the f32 HIGHEST-precision reference) make a few
    # 1e-2 of absolute error the expected behavior for these magnitudes.
    assert jnp.allclose(out, ref, atol=3e-2, rtol=3e-2), f"max abs err {max_err}"

    print("KERNEL_OK")
</pallas_src>

<mosaic_0001>
module attributes {stable_mosaic.version = 11 : i64} {
  func.func @_linear_bias_kernel(%arg0: i32, %arg1: i32, %arg2: memref<160x128xbf16, #tpu.memory_space<vmem>>, %arg3: memref<128x384xbf16, #tpu.memory_space<vmem>>, %arg4: memref<1x384xf32, #tpu.memory_space<vmem>>, %arg5: memref<160x384xbf16, #tpu.memory_space<vmem>>) attributes {dimension_semantics = [#tpu.dimension_semantics<parallel>, #tpu.dimension_semantics<parallel>], iteration_bounds = array<i64: 1, 1>, scalar_prefetch = 0 : i64, scratch_operands = 0 : i64, tpu.core_type = #tpu.core_type<tc>, window_params = [{transform_indices = @transform_0, window_bounds = array<i64: 160, 128>}, {transform_indices = @transform_1, window_bounds = array<i64: 128, 384>}, {transform_indices = @transform_2, window_bounds = array<i64: 1, 384>}, {transform_indices = @transform_3, window_bounds = array<i64: 160, 384>}]} {
    %c0 = arith.constant 0 : index
    %c0_0 = arith.constant 0 : index
    %0 = vector.load %arg2[%c0, %c0_0] : memref<160x128xbf16, #tpu.memory_space<vmem>>, vector<160x128xbf16>
    %c0_1 = arith.constant 0 : index
    %c0_2 = arith.constant 0 : index
    %1 = vector.load %arg3[%c0_1, %c0_2] : memref<128x384xbf16, #tpu.memory_space<vmem>>, vector<128x384xbf16>
    %cst = arith.constant dense<0.000000e+00> : vector<160x384xf32>
    %2 = tpu.matmul %0, %1, %cst {dimension_numbers = #tpu.dot_dimension_numbers<[1], [0], [0], [1], [0, 0, 1, 1], [], []>} : vector<160x128xbf16>, vector<128x384xbf16>, vector<160x384xf32> -> vector<160x384xf32>
    %c0_3 = arith.constant 0 : index
    %c0_4 = arith.constant 0 : index
    %3 = vector.load %arg4[%c0_3, %c0_4] : memref<1x384xf32, #tpu.memory_space<vmem>>, vector<1x384xf32>
    %4 = vector.broadcast %3 : vector<1x384xf32> to vector<160x384xf32>
    %5 = arith.addf %2, %4 : vector<160x384xf32>
    %6 = arith.truncf %5 : vector<160x384xf32> to vector<160x384xbf16>
    %c0_5 = arith.constant 0 : index
    %c0_6 = arith.constant 0 : index
    %7 = vector.load %arg5[%c0_5, %c0_6] : memref<160x384xbf16, #tpu.memory_space<vmem>>, vector<160x384xbf16>
    tpu.vector_store %arg5[%c0_5, %c0_6], %6 {strides = array<i32>} : memref<160x384xbf16, #tpu.memory_space<vmem>>, vector<160x384xbf16>,
    return
  }
  func.func @transform_0(%arg0: i32, %arg1: i32) -> (i32, i32) {
    %c0_i32 = arith.constant 0 : i32
    %c0_i32_0 = arith.constant 0 : i32
    return %arg0, %c0_i32 : i32, i32
  }
  func.func @transform_1(%arg0: i32, %arg1: i32) -> (i32, i32) {
    %c0_i32 = arith.constant 0 : i32
    %c0_i32_0 = arith.constant 0 : i32
    return %c0_i32, %arg1 : i32, i32
  }
  func.func @transform_2(%arg0: i32, %arg1: i32) -> (i32, i32) {
    %c0_i32 = arith.constant 0 : i32
    %c0_i32_0 = arith.constant 0 : i32
    return %c0_i32, %arg1 : i32, i32
  }
  func.func @transform_3(%arg0: i32, %arg1: i32) -> (i32, i32) {
    %c0_i32 = arith.constant 0 : i32
    return %arg0, %arg1 : i32, i32
  }
}

module attributes {stable_mosaic.version = 11 : i64} {
  func.func @_flash_attn_kernel(%arg0: i32, %arg1: i32, %arg2: i32, %arg3: i32, %arg4: memref<1x2x80x64xbf16, #tpu.memory_space<vmem>>, %arg5: memref<1x2x80x64xbf16, #tpu.memory_space<vmem>>, %arg6: memref<1x2x80x64xbf16, #tpu.memory_space<vmem>>, %arg7: memref<1x80x128xbf16, #tpu.memory_space<vmem>>, %arg8: memref<2x80x1xf32, #tpu.memory_space<vmem>>, %arg9: memref<2x80x1xf32, #tpu.memory_space<vmem>>, %arg10: memref<2x80x64xf32, #tpu.memory_space<vmem>>) attributes {dimension_semantics = [#tpu.dimension_semantics<parallel>, #tpu.dimension_semantics<parallel>, #tpu.dimension_semantics<parallel>, #tpu.dimension_semantics<arbitrary>], iteration_bounds = array<i64: 2, 1, 1, 1>, scalar_prefetch = 0 : i64, scratch_operands = 3 : i64, tpu.core_type = #tpu.core_type<tc>, window_params = [{transform_indices = @transform_0, window_bounds = array<i64: 1, 2, 80, 64>}, {transform_indices = @transform_1, window_bounds = array<i64: 1, 2, 80, 64>}, {transform_indices = @transform_2, window_bounds = array<i64: 1, 2, 80, 64>}, {transform_indices = @transform_3, window_bounds = array<i64: 1, 80, 128>}]} {
    %c0_i32 = arith.constant 0 : i32
    %0 = arith.cmpi eq, %arg3, %c0_i32 : i32
    %1 = arith.extui %0 : i1 to i32
    %c0_i32_0 = arith.constant 0 : i32
    %2 = arith.cmpi ne, %1, %c0_i32_0 : i32
    scf.if %2 {
      %cst_37 = arith.constant 0xFF800000 : f32
      %40 = vector.broadcast %cst_37 : f32 to vector<2x80x1xf32>
      %c0_38 = arith.constant 0 : index
      %c0_39 = arith.constant 0 : index
      %c0_40 = arith.constant 0 : index
      %41 = vector.load %arg8[%c0_38, %c0_39, %c0_40] : memref<2x80x1xf32, #tpu.memory_space<vmem>>, vector<2x80x1xf32>
      tpu.vector_store %arg8[%c0_38, %c0_39, %c0_40], %40 {strides = array<i32>} : memref<2x80x1xf32, #tpu.memory_space<vmem>>, vector<2x80x1xf32>,
      %cst_41 = arith.constant 0.000000e+00 : f32
      %42 = vector.broadcast %cst_41 : f32 to vector<2x80x1xf32>
      %c0_42 = arith.constant 0 : index
      %c0_43 = arith.constant 0 : index
      %c0_44 = arith.constant 0 : index
      %43 = vector.load %arg9[%c0_42, %c0_43, %c0_44] : memref<2x80x1xf32, #tpu.memory_space<vmem>>, vector<2x80x1xf32>
      tpu.vector_store %arg9[%c0_42, %c0_43, %c0_44], %42 {strides = array<i32>} : memref<2x80x1xf32, #tpu.memory_space<vmem>>, vector<2x80x1xf32>,
      %cst_45 = arith.constant 0.000000e+00 : f32
      %44 = vector.broadcast %cst_45 : f32 to vector<2x80x64xf32>
      %c0_46 = arith.constant 0 : index
      %c0_47 = arith.constant 0 : index
      %c0_48 = arith.constant 0 : index
      %45 = vector.load %arg10[%c0_46, %c0_47, %c0_48] : memref<2x80x64xf32, #tpu.memory_space<vmem>>, vector<2x80x64xf32>
      tpu.vector_store %arg10[%c0_46, %c0_47, %c0_48], %44 {strides = array<i32>} : memref<2x80x64xf32, #tpu.memory_space<vmem>>, vector<2x80x64xf32>,
    } else {
    }
    %c0 = arith.constant 0 : index
    %c0_1 = arith.constant 0 : index
    %c0_2 = arith.constant 0 : index
    %c0_3 = arith.constant 0 : index
    %3 = vector.load %arg4[%c0, %c0_1, %c0_2, %c0_3] : memref<1x2x80x64xbf16, #tpu.memory_space<vmem>>, vector<1x2x80x64xbf16>
    %4 = vector.shape_cast %3 : vector<1x2x80x64xbf16> to vector<2x80x64xbf16>
    %c0_4 = arith.constant 0 : index
    %c0_5 = arith.constant 0 : index
    %c0_6 = arith.constant 0 : index
    %c0_7 = arith.constant 0 : index
    %5 = vector.load %arg5[%c0_4, %c0_5, %c0_6, %c0_7] : memref<1x2x80x64xbf16, #tpu.memory_space<vmem>>, vector<1x2x80x64xbf16>
    %6 = vector.shape_cast %5 : vector<1x2x80x64xbf16> to vector<2x80x64xbf16>
    %c0_8 = arith.constant 0 : index
    %c0_9 = arith.constant 0 : index
    %c0_10 = arith.constant 0 : index
    %c0_11 = arith.constant 0 : index
    %7 = vector.load %arg6[%c0_8, %c0_9, %c0_10, %c0_11] : memref<1x2x80x64xbf16, #tpu.memory_space<vmem>>, vector<1x2x80x64xbf16>
    %8 = vector.shape_cast %7 : vector<1x2x80x64xbf16> to vector<2x80x64xbf16>
    %cst = arith.constant dense<0.000000e+00> : vector<2x80x80xf32>
    %9 = tpu.matmul %4, %6, %cst {dimension_numbers = #tpu.dot_dimension_numbers<[2], [2], [1], [1], [0, 0, 0, 1, 1, 1], [0], [0]>} : vector<2x80x64xbf16>, vector<2x80x64xbf16>, vector<2x80x80xf32> -> vector<2x80x80xf32>
    %c0_i32_12 = arith.constant 0 : i32
    %10 = arith.cmpi eq, %arg3, %c0_i32_12 : i32
    %11 = arith.extui %10 : i1 to i32
    %c0_i32_13 = arith.constant 0 : i32
    %12 = arith.cmpi ne, %11, %c0_i32_13 : i32
    %13 = scf.if %12 -> (vector<2x80x80xf32>) {
      %c80_i32 = arith.constant 80 : i32
      %40 = arith.muli %arg3, %c80_i32 : i32
      %41 = tpu.iota {dimensions = array<i32: 2>} : vector<2x80x80xi32>
      %42 = vector.broadcast %40 : i32 to vector<2x80x80xi32>
      %43 = arith.addi %42, %41 : vector<2x80x80xi32>
      %c77_i32 = arith.constant 77 : i32
      %44 = vector.broadcast %c77_i32 : i32 to vector<2x80x80xi32>
      %45 = arith.cmpi slt, %43, %44 : vector<2x80x80xi32>
      %cst_37 = arith.constant -1.000000e+30 : f32
      %46 = vector.broadcast %cst_37 : f32 to vector<2x80x80xf32>
      %47 = arith.select %45, %9, %46 : vector<2x80x80xi1>, vector<2x80x80xf32>
      scf.yield %47 : vector<2x80x80xf32>
    } else {
      scf.yield %9 : vector<2x80x80xf32>
    }
    %c0_14 = arith.constant 0 : index
    %c0_15 = arith.constant 0 : index
    %c0_16 = arith.constant 0 : index
    %14 = vector.load %arg8[%c0_14, %c0_15, %c0_16] : memref<2x80x1xf32, #tpu.memory_space<vmem>>, vector<2x80x1xf32>
    %cst_17 = arith.constant dense<0xFF800000> : vector<2x80xf32>
    %15 = vector.multi_reduction <maximumf>, %13, %cst_17 [2] : vector<2x80x80xf32> to vector<2x80xf32>
    %16 = vector.shape_cast %15 : vector<2x80xf32> to vector<2x80x1xf32>
    %17 = arith.maximumf %14, %16 : vector<2x80x1xf32>
    %18 = arith.subf %14, %17 : vector<2x80x1xf32>
    %19 = math.exp %18 : vector<2x80x1xf32>
    %20 = vector.broadcast %17 : vector<2x80x1xf32> to vector<2x80x80xf32>
    %21 = arith.subf %13, %20 : vector<2x80x80xf32>
    %22 = math.exp %21 : vector<2x80x80xf32>
    %c0_18 = arith.constant 0 : index
    %c0_19 = arith.constant 0 : index
    %c0_20 = arith.constant 0 : index
    %23 = vector.load %arg9[%c0_18, %c0_19, %c0_20] : memref<2x80x1xf32, #tpu.memory_space<vmem>>, vector<2x80x1xf32>
    %24 = arith.mulf %19, %23 : vector<2x80x1xf32>
    %cst_21 = arith.constant dense<0.000000e+00> : vector<2x80xf32>
    %25 = vector.multi_reduction <add>, %22, %cst_21 [2] : vector<2x80x80xf32> to vector<2x80xf32>
    %26 = vector.shape_cast %25 : vector<2x80xf32> to vector<2x80x1xf32>
    %27 = arith.addf %24, %26 : vector<2x80x1xf32>
    %c0_22 = arith.constant 0 : index
    %c0_23 = arith.constant 0 : index
    %c0_24 = arith.constant 0 : index
    %28 = vector.load %arg9[%c0_22, %c0_23, %c0_24] : memref<2x80x1xf32, #tpu.memory_space<vmem>>, vector<2x80x1xf32>
    tpu.vector_store %arg9[%c0_22, %c0_23, %c0_24], %27 {strides = array<i32>} : memref<2x80x1xf32, #tpu.memory_space<vmem>>, vector<2x80x1xf32>,
    %c0_25 = arith.constant 0 : index
    %c0_26 = arith.constant 0 : index
    %c0_27 = arith.constant 0 : index
    %29 = vector.load %arg10[%c0_25, %c0_26, %c0_27] : memref<2x80x64xf32, #tpu.memory_space<vmem>>, vector<2x80x64xf32>
    %30 = vector.broadcast %19 : vector<2x80x1xf32> to vector<2x80x64xf32>
    %31 = arith.mulf %30, %29 : vector<2x80x64xf32>
    %32 = arith.truncf %22 : vector<2x80x80xf32> to vector<2x80x80xbf16>
    %cst_28 = arith.constant dense<0.000000e+00> : vector<2x80x64xf32>
    %33 = tpu.matmul %32, %8, %cst_28 {dimension_numbers = #tpu.dot_dimension_numbers<[2], [1], [1], [2], [0, 0, 0, 1, 1, 2], [0], [0]>} : vector<2x80x80xbf16>, vector<2x80x64xbf16>, vector<2x80x64xf32> -> vector<2x80x64xf32>
    %34 = arith.addf %31, %33 : vector<2x80x64xf32>
    %c0_29 = arith.constant 0 : index
    %c0_30 = arith.constant 0 : index
    %c0_31 = arith.constant 0 : index
    %35 = vector.load %arg10[%c0_29, %c0_30, %c0_31] : memref<2x80x64xf32, #tpu.memory_space<vmem>>, vector<2x80x64xf32>
    tpu.vector_store %arg10[%c0_29, %c0_30, %c0_31], %34 {strides = array<i32>} : memref<2x80x64xf32, #tpu.memory_space<vmem>>, vector<2x80x64xf32>,
    %c0_32 = arith.constant 0 : index
    %c0_33 = arith.constant 0 : index
    %c0_34 = arith.constant 0 : index
    %36 = vector.load %arg8[%c0_32, %c0_33, %c0_34] : memref<2x80x1xf32, #tpu.memory_space<vmem>>, vector<2x80x1xf32>
    tpu.vector_store %arg8[%c0_32, %c0_33, %c0_34], %17 {strides = array<i32>} : memref<2x80x1xf32, #tpu.memory_space<vmem>>, vector<2x80x1xf32>,
    %c0_i32_35 = arith.constant 0 : i32
    %37 = arith.cmpi eq, %arg3, %c0_i32_35 : i32
    %38 = arith.extui %37 : i1 to i32
    %c0_i32_36 = arith.constant 0 : i32
    %39 = arith.cmpi ne, %38, %c0_i32_36 : i32
    scf.if %39 {
      %c0_37 = arith.constant 0 : index
      %c0_38 = arith.constant 0 : index
      %c0_39 = arith.constant 0 : index
      %40 = vector.load %arg9[%c0_37, %c0_38, %c0_39] : memref<2x80x1xf32, #tpu.memory_space<vmem>>, vector<2x80x1xf32>
      %41 = tpu.reciprocal %40 {approx = true} : vector<2x80x1xf32> -> vector<2x80x1xf32>
      %c0_40 = arith.constant 0 : index
      %c0_41 = arith.constant 0 : index
      %c0_42 = arith.constant 0 : index
      %42 = vector.load %arg10[%c0_40, %c0_41, %c0_42] : memref<2x80x64xf32, #tpu.memory_space<vmem>>, vector<2x80x64xf32>
      %43 = vector.broadcast %41 : vector<2x80x1xf32> to vector<2x80x64xf32>
      %44 = arith.mulf %42, %43 : vector<2x80x64xf32>
      %45 = vector.extract_strided_slice %44 {offsets = [0, 0, 0], sizes = [1, 80, 64], strides = [1, 1, 1]} : vector<2x80x64xf32> to vector<1x80x64xf32>
      %46 = vector.shape_cast %45 : vector<1x80x64xf32> to vector<80x64xf32>
      %47 = vector.extract_strided_slice %44 {offsets = [1, 0, 0], sizes = [1, 80, 64], strides = [1, 1, 1]} : vector<2x80x64xf32> to vector<1x80x64xf32>
      %48 = vector.shape_cast %47 : vector<1x80x64xf32> to vector<80x64xf32>
      %49 = tpu.concatenate %46, %48 in 1 : vector<80x64xf32>, vector<80x64xf32> -> vector<80x128xf32>
      %50 = arith.truncf %49 : vector<80x128xf32> to vector<80x128xbf16>
      %c0_43 = arith.constant 0 : index
      %c0_44 = arith.constant 0 : index
      %c0_45 = arith.constant 0 : index
      %51 = vector.load %arg7[%c0_43, %c0_44, %c0_45] : memref<1x80x128xbf16, #tpu.memory_space<vmem>>, vector<1x80x128xbf16>
      %52 = vector.shape_cast %51 : vector<1x80x128xbf16> to vector<80x128xbf16>
      %53 = vector.shape_cast %50 : vector<80x128xbf16> to vector<1x80x128xbf16>
      tpu.vector_store %arg7[%c0_43, %c0_44, %c0_45], %53 {strides = array<i32>} : memref<1x80x128xbf16, #tpu.memory_space<vmem>>, vector<1x80x128xbf16>,
    } else {
    }
    return
  }
  func.func @transform_0(%arg0: i32, %arg1: i32, %arg2: i32, %arg3: i32) -> (i32, i32, i32, i32) {
    %c0_i32 = arith.constant 0 : i32
    %c0_i32_0 = arith.constant 0 : i32
    return %arg0, %arg1, %arg2, %c0_i32 : i32, i32, i32, i32
  }
  func.func @transform_1(%arg0: i32, %arg1: i32, %arg2: i32, %arg3: i32) -> (i32, i32, i32, i32) {
    %c0_i32 = arith.constant 0 : i32
    %c0_i32_0 = arith.constant 0 : i32
    return %arg0, %arg1, %arg3, %c0_i32 : i32, i32, i32, i32
  }
  func.func @transform_2(%arg0: i32, %arg1: i32, %arg2: i32, %arg3: i32) -> (i32, i32, i32, i32) {
    %c0_i32 = arith.constant 0 : i32
    %c0_i32_0 = arith.constant 0 : i32
    return %arg0, %arg1, %arg3, %c0_i32 : i32, i32, i32, i32
  }
  func.func @transform_3(%arg0: i32, %arg1: i32, %arg2: i32, %arg3: i32) -> (i32, i32, i32) {
    %c0_i32 = arith.constant 0 : i32
    return %arg0, %arg2, %arg1 : i32, i32, i32
  }
}

module attributes {stable_mosaic.version = 11 : i64} {
  func.func @_linear_bias_kernel(%arg0: i32, %arg1: i32, %arg2: memref<160x128xbf16, #tpu.memory_space<vmem>>, %arg3: memref<128x128xbf16, #tpu.memory_space<vmem>>, %arg4: memref<1x128xf32, #tpu.memory_space<vmem>>, %arg5: memref<160x128xf32, #tpu.memory_space<vmem>>) attributes {dimension_semantics = [#tpu.dimension_semantics<parallel>, #tpu.dimension_semantics<parallel>], iteration_bounds = array<i64: 1, 1>, scalar_prefetch = 0 : i64, scratch_operands = 0 : i64, tpu.core_type = #tpu.core_type<tc>, window_params = [{transform_indices = @transform_0, window_bounds = array<i64: 160, 128>}, {transform_indices = @transform_1, window_bounds = array<i64: 128, 128>}, {transform_indices = @transform_2, window_bounds = array<i64: 1, 128>}, {transform_indices = @transform_3, window_bounds = array<i64: 160, 128>}]} {
    %c0 = arith.constant 0 : index
    %c0_0 = arith.constant 0 : index
    %0 = vector.load %arg2[%c0, %c0_0] : memref<160x128xbf16, #tpu.memory_space<vmem>>, vector<160x128xbf16>
    %c0_1 = arith.constant 0 : index
    %c0_2 = arith.constant 0 : index
    %1 = vector.load %arg3[%c0_1, %c0_2] : memref<128x128xbf16, #tpu.memory_space<vmem>>, vector<128x128xbf16>
    %cst = arith.constant dense<0.000000e+00> : vector<160x128xf32>
    %2 = tpu.matmul %0, %1, %cst {dimension_numbers = #tpu.dot_dimension_numbers<[1], [0], [0], [1], [0, 0, 1, 1], [], []>} : vector<160x128xbf16>, vector<128x128xbf16>, vector<160x128xf32> -> vector<160x128xf32>
    %c0_3 = arith.constant 0 : index
    %c0_4 = arith.constant 0 : index
    %3 = vector.load %arg4[%c0_3, %c0_4] : memref<1x128xf32, #tpu.memory_space<vmem>>, vector<1x128xf32>
    %4 = vector.broadcast %3 : vector<1x128xf32> to vector<160x128xf32>
    %5 = arith.addf %2, %4 : vector<160x128xf32>
    %c0_5 = arith.constant 0 : index
    %c0_6 = arith.constant 0 : index
    %6 = vector.load %arg5[%c0_5, %c0_6] : memref<160x128xf32, #tpu.memory_space<vmem>>, vector<160x128xf32>
    tpu.vector_store %arg5[%c0_5, %c0_6], %5 {strides = array<i32>} : memref<160x128xf32, #tpu.memory_space<vmem>>, vector<160x128xf32>,
    return
  }
  func.func @transform_0(%arg0: i32, %arg1: i32) -> (i32, i32) {
    %c0_i32 = arith.constant 0 : i32
    %c0_i32_0 = arith.constant 0 : i32
    return %arg0, %c0_i32 : i32, i32
  }
  func.func @transform_1(%arg0: i32, %arg1: i32) -> (i32, i32) {
    %c0_i32 = arith.constant 0 : i32
    %c0_i32_0 = arith.constant 0 : i32
    return %c0_i32, %arg1 : i32, i32
  }
  func.func @transform_2(%arg0: i32, %arg1: i32) -> (i32, i32) {
    %c0_i32 = arith.constant 0 : i32
    %c0_i32_0 = arith.constant 0 : i32
    return %c0_i32, %arg1 : i32, i32
  }
  func.func @transform_3(%arg0: i32, %arg1: i32) -> (i32, i32) {
    %c0_i32 = arith.constant 0 : i32
    return %arg0, %arg1 : i32, i32
  }
}

</mosaic_0001>

<bundles_post_ra>
// kernel: multi_head_dot_product_attention.5
= control target key start
LH: loop header
LB: loop body
LE: loop exit
PB: predicated region body
PF: predicated region fallthrough
CT: control target
= control target key end

     0   :  { %s547_s1 = inlined_call_operand.vmem [shape: bf16[128,128], index: 1, kind: input, shape index: {}]   ;;  %s548_s0 = inlined_call_operand.vmem [shape: bf16[160,128], index: 0, kind: input, shape index: {}]   ;;  %s549_s2 = inlined_call_operand.vmem [shape: f32[1,128], index: 2, kind: input, shape index: {}]   ;;  %s550_s3 = inlined_call_operand.vmem [shape: f32[160,128], index: 3, kind: output, shape index: {}]  }
   0x1   :  { %v392_v0 = vld [vmem:[%s547_s1] sm:$0xff]   ;;  %v393_v1 = vld [vmem:[%s547_s1 + $0x8] sm:$0xff]   ;;  %v394_v2 = vld [vmem:[%s547_s1 + $0x10] sm:$0xff]  }
   0x2   :  { %340 = vmatprep.subr.bf16.mxu0 %v392_v0  ;;  %376 = vmatprep.subr.bf16.mxu1 %v392_v0  ;;  %v395_v3 = vld [vmem:[%s547_s1 + $0x18] sm:$0xff]   ;;  %v400_v4 = vld [vmem:[%s548_s0] sm:$0xff]   ;;  %v402_v5 = vld [vmem:[%s548_s0 + $0x30] sm:$0xff]  }
   0x3   :  { %341 = vmatpush3.bf16.msra.mxu0 %v392_v0  ;;  %384 = vmatpush3.bf16.msra.mxu1 %v392_v0  ;;  %v396_v6 = vld [vmem:[%s547_s1 + $0x20] sm:$0xff]   ;;  %v397_v7 = vld [vmem:[%s547_s1 + $0x28] sm:$0xff]   ;;  %v398_v8 = vld [vmem:[%s547_s1 + $0x30] sm:$0xff]  }
   0x4   :  { %342 = vmatprep.subr.bf16.mxu0 %v393_v1  ;;  %377 = vmatprep.subr.bf16.mxu1 %v393_v1  ;;  %v399_v9 = vld [vmem:[%s547_s1 + $0x38] sm:$0xff]   ;;  %v401_v10 = vld [vmem:[%s548_s0 + $0x8] sm:$0xff]   ;;  %v404_v12 = vld [vmem:[%s548_s0 + $0x10] sm:$0xff]  }
   0x5   :  { %356 = vmatprep.mubr.bf16.mxu0 %v400_v4  ;;  %368 = vmatprep.mubr.bf16.mxu1 %v402_v5  ;;  %v403_v11 = vld [vmem:[%s548_s0 + $0x38] sm:$0xff]   ;;  %v406_v13 = vld [vmem:[%s548_s0 + $0x40] sm:$0xff]   ;;  %v407_v15 = vld [vmem:[%s548_s0 + $0x48] sm:$0xff]  }
   0x6   :  { %v405_v14 = vld [vmem:[%s548_s0 + $0x18] sm:$0xff]   ;;  %v408_v16 = vld [vmem:[%s548_s0 + $0x20] sm:$0xff]   ;;  %v409_v17 = vld [vmem:[%s548_s0 + $0x28] sm:$0xff]  }
   0x7   :  { %343 = vmatpush3.bf16.msra.mxu0 %v393_v1  ;;  %385 = vmatpush3.bf16.msra.mxu1 %v393_v1  ;;  %v303_v18 = vld [vmem:[%s549_s2] ss:$0 sm:$0xff] }
   0x8   :  { %344 = vmatprep.subr.bf16.mxu0 %v394_v2  ;;  %378 = vmatprep.subr.bf16.mxu1 %v394_v2 }
   0xb   :  { %345 = vmatpush3.bf16.msra.mxu0 %v394_v2  ;;  %386 = vmatpush3.bf16.msra.mxu1 %v394_v2 }
   0xc   :  { %346 = vmatprep.subr.bf16.mxu0 %v395_v3  ;;  %379 = vmatprep.subr.bf16.mxu1 %v395_v3 }
   0xf   :  { %347 = vmatpush3.bf16.msra.mxu0 %v395_v3  ;;  %387 = vmatpush3.bf16.msra.mxu1 %v395_v3 }
  0x10   :  { %348 = vmatprep.subr.bf16.mxu0 %v396_v6  ;;  %380 = vmatprep.subr.bf16.mxu1 %v396_v6 }
  0x13   :  { %349 = vmatpush3.bf16.msra.mxu0 %v396_v6  ;;  %388 = vmatpush3.bf16.msra.mxu1 %v396_v6 }
  0x14   :  { %350 = vmatprep.subr.bf16.mxu0 %v397_v7  ;;  %381 = vmatprep.subr.bf16.mxu1 %v397_v7 }
  0x17   :  { %351 = vmatpush3.bf16.msra.mxu0 %v397_v7  ;;  %389 = vmatpush3.bf16.msra.mxu1 %v397_v7 }
  0x18   :  { %352 = vmatprep.subr.bf16.mxu0 %v398_v8  ;;  %382 = vmatprep.subr.bf16.mxu1 %v398_v8 }
  0x1b   :  { %353 = vmatpush3.bf16.msra.mxu0 %v398_v8  ;;  %390 = vmatpush3.bf16.msra.mxu1 %v398_v8 }
  0x1c   :  { %354 = vmatprep.subr.bf16.mxu0 %v399_v9  ;;  %383 = vmatprep.subr.bf16.mxu1 %v399_v9 }
  0x1f   :  { %355 = vmatpush3.bf16.msra.mxu0 %v399_v9  ;;  %391 = vmatpush3.bf16.msra.mxu1 %v399_v9 }
  0x22   :  { %357 = vmatmul.mubr.bf16.vlgmr.msra.gmra.mrb[0].mxu0 %v401_v10  ;;  %369 = vmatmul.mubr.bf16.vlgmr.msra.gmra.mrb[0].mxu1 %v403_v11 }
  0x23   :  { %360 = vmatprep.mubr.bf16.mxu0 %v404_v12  ;;  %372 = vmatprep.mubr.bf16.mxu1 %v406_v13 }
  0x2a   :  { %361 = vmatmul.mubr.bf16.gmra.mrb[4].mxu0 %v405_v14  ;;  %373 = vmatmul.mubr.bf16.gmra.mrb[4].mxu1 %v407_v15 }
  0x2b   :  { %364 = vmatprep.mubr.bf16.mxu0 %v408_v16 }
  0x32   :  { %365 = vmatmul.mubr.bf16.gmra.mrb[8].mxu0 %v409_v17 }
  0xf5   :  { %v358_v19 = vpop.f32.mrb[0].mxu0  ;;  %v370_v20 = vpop.f32.mrb[0].mxu1 }
  0xf6   :  { %v209_v21 = vadd.f32 %v358_v19, %v303_v18  ;;  %v200_v22 = vpop.f32.mrb[1].mxu0  ;;  %v257_v23 = vadd.f32 %v370_v20, %v303_v18  ;;  %v248_v24 = vpop.f32.mrb[1].mxu1 }
  0xf7   :  { %v201_v25 = vadd.f32 %v303_v18, %v200_v22  ;;  %v359_v26 = vpop.f32.mrb[2].mxu0  ;;  %v249_v27 = vadd.f32 %v303_v18, %v248_v24  ;;  %v371_v28 = vpop.f32.mrb[2].mxu1 }
  0xf8   :  { %281 = vst [vmem:[%s550_s3 + $0x10] sm:$0xff] %v209_v21  ;;  %v212_v29 = vadd.f32 %v359_v26, %v303_v18  ;;  %v203_v30 = vpop.f32.mrb[3].mxu0  ;;  %293 = vst [vmem:[%s550_s3 + $0x70] sm:$0xff] %v257_v23  ;;  %v260_v31 = vadd.f32 %v371_v28, %v303_v18  ;;  %v251_v32 = vpop.f32.mrb[3].mxu1 }
  0xf9   :  { %279 = vst [vmem:[%s550_s3] sm:$0xff] %v201_v25  ;;  %v204_v33 = vadd.f32 %v303_v18, %v203_v30  ;;  %291 = vst [vmem:[%s550_s3 + $0x60] sm:$0xff] %v249_v27  ;;  %v252_v34 = vadd.f32 %v303_v18, %v251_v32 }
  0xfa   :  { %282 = vst [vmem:[%s550_s3 + $0x18] sm:$0xff] %v212_v29  ;;  %294 = vst [vmem:[%s550_s3 + $0x78] sm:$0xff] %v260_v31 }
  0xfb   :  { %280 = vst [vmem:[%s550_s3 + $0x8] sm:$0xff] %v204_v33  ;;  %292 = vst [vmem:[%s550_s3 + $0x68] sm:$0xff] %v252_v34 }
  0xfd   :  { %v362_v35 = vpop.f32.mrb[4].mxu0  ;;  %v374_v36 = vpop.f32.mrb[4].mxu1 }
  0xfe   :  { %v225_v37 = vadd.f32 %v362_v35, %v303_v18  ;;  %v216_v38 = vpop.f32.mrb[5].mxu0  ;;  %v273_v39 = vadd.f32 %v374_v36, %v303_v18  ;;  %v264_v40 = vpop.f32.mrb[5].mxu1 }
  0xff   :  { %v217_v41 = vadd.f32 %v303_v18, %v216_v38  ;;  %v363_v42 = vpop.f32.mrb[6].mxu0  ;;  %v265_v43 = vadd.f32 %v303_v18, %v264_v40  ;;  %v375_v44 = vpop.f32.mrb[6].mxu1 }
 0x100   :  { %285 = vst [vmem:[%s550_s3 + $0x30] sm:$0xff] %v225_v37  ;;  %v228_v45 = vadd.f32 %v363_v42, %v303_v18  ;;  %v219_v46 = vpop.f32.mrb[7].mxu0  ;;  %297 = vst [vmem:[%s550_s3 + $0x90] sm:$0xff] %v273_v39  ;;  %v276_v47 = vadd.f32 %v375_v44, %v303_v18  ;;  %v267_v48 = vpop.f32.mrb[7].mxu1 }
 0x101   :  { %283 = vst [vmem:[%s550_s3 + $0x20] sm:$0xff] %v217_v41  ;;  %v220_v49 = vadd.f32 %v303_v18, %v219_v46  ;;  %295 = vst [vmem:[%s550_s3 + $0x80] sm:$0xff] %v265_v43  ;;  %v268_v50 = vadd.f32 %v303_v18, %v267_v48 }
 0x102   :  { %286 = vst [vmem:[%s550_s3 + $0x38] sm:$0xff] %v228_v45  ;;  %298 = vst [vmem:[%s550_s3 + $0x98] sm:$0xff] %v276_v47 }
 0x103   :  { %284 = vst [vmem:[%s550_s3 + $0x28] sm:$0xff] %v220_v49  ;;  %296 = vst [vmem:[%s550_s3 + $0x88] sm:$0xff] %v268_v50 }
 0x105   :  { %v366_v51 = vpop.f32.mrb[8].mxu0 }
 0x106   :  { %v241_v52 = vadd.f32 %v366_v51, %v303_v18  ;;  %v232_v53 = vpop.f32.mrb[9].mxu0 }
 0x107   :  { %v233_v54 = vadd.f32 %v303_v18, %v232_v53  ;;  %v367_v55 = vpop.f32.mrb[10].mxu0 }
 0x108   :  { %289 = vst [vmem:[%s550_s3 + $0x50] sm:$0xff] %v241_v52  ;;  %v244_v56 = vadd.f32 %v367_v55, %v303_v18  ;;  %v235_v57 = vpop.f32.mrb[11].mxu0 }
 0x109   :  { %287 = vst [vmem:[%s550_s3 + $0x40] sm:$0xff] %v233_v54  ;;  %v236_v58 = vadd.f32 %v303_v18, %v235_v57 }
 0x10a   :  { %290 = vst [vmem:[%s550_s3 + $0x58] sm:$0xff] %v244_v56 }
 0x10b   :  { %288 = vst [vmem:[%s550_s3 + $0x48] sm:$0xff] %v236_v58 }

// kernel: multi_head_dot_product_attention.3
= control target key start
LH: loop header
LB: loop body
LE: loop exit
PB: predicated region body
PF: predicated region fallthrough
CT: control target
= control target key end

     0   :  { %v973_v1 = vmov 0   ;;  %v69_v35 = vlaneseq  ;;  %s1295_s1 = inlined_call_operand.vmem [shape: bf16[128,384], index: 1, kind: input, shape index: {}]   ;;  %s1296_s0 = inlined_call_operand.vmem [shape: bf16[160,128], index: 0, kind: input, shape index: {}]   ;;  %s1297_s2 = inlined_call_operand.vmem [shape: f32[1,384], index: 2, kind: input, shape index: {}]   ;;  %s1298_s3 = inlined_call_operand.vmem [shape: bf16[160,384], index: 3, kind: output, shape index: {}]  }
   0x1   :  { %v931_v0 = vld [vmem:[%s1295_s1 + $0x4] ss:$12 sps:$4 sm:$0xff]   ;;  %304 = vmatprep.mubr.bf16.mxu0 %v973_v1  ;;  %v933_v2 = vld [vmem:[%s1295_s1] ss:$12 sps:$4 sm:$0xff]   ;;  %v934_v3 = vld [vmem:[%s1295_s1 + $0x1c] ss:$12 sps:$4 sm:$0xff]  }
   0x2   :  { %272 = vmatprep.subr.bf16.mxu0 %v931_v0  ;;  %v936_v4 = vld [vmem:[%s1295_s1 + $0x18] ss:$12 sps:$4 sm:$0xff]   ;;  %v937_v5 = vld [vmem:[%s1295_s1 + $0x34] ss:$12 sps:$4 sm:$0xff]   ;;  %v939_v6 = vld [vmem:[%s1295_s1 + $0x30] ss:$12 sps:$4 sm:$0xff]  }
   0x3   :  { %273 = vmatpush1.bf16.msra.mxu0 %v933_v2  ;;  %v940_v7 = vld [vmem:[%s1295_s1 + $0x4c] ss:$12 sps:$4 sm:$0xff]   ;;  %v942_v8 = vld [vmem:[%s1295_s1 + $0x48] ss:$12 sps:$4 sm:$0xff]   ;;  %v943_v9 = vld [vmem:[%s1295_s1 + $0x64] ss:$12 sps:$4 sm:$0xff]  }
   0x4   :  { %274 = vmatprep.subr.bf16.mxu0 %v934_v3  ;;  %v955_v10 = vld [vmem:[%s1296_s0] sm:$0xff]   ;;  %v956_v11 = vld [vmem:[%s1295_s1 + $0x8] ss:$12 sps:$4 sm:$0xff]   ;;  %v961_v18 = vld [vmem:[%s1295_s1 + $0x50] ss:$12 sps:$4 sm:$0xff]   ;;  %v70_v36 = vshrl.u32 %v69_v35, 7 }
   0x5   :  { %v945_v12 = vld [vmem:[%s1295_s1 + $0x60] ss:$12 sps:$4 sm:$0xff]   ;;  %910 = vmatprep.mubr.bf16.mxu1 %v955_v10  ;;  %894 = vmatprep.subr.bf16.mxu1 %v956_v11  ;;  %v946_v14 = vld [vmem:[%s1295_s1 + $0x7c] ss:$12 sps:$4 sm:$0xff]   ;;  %v959_v15 = vld [vmem:[%s1295_s1 + $0x38] ss:$12 sps:$4 sm:$0xff]  }
   0x6   :  { %v958_v13 = vld [vmem:[%s1295_s1 + $0x20] ss:$12 sps:$4 sm:$0xff]   ;;  %895 = vmatpush3.bf16.msra.mxu1 %v956_v11  ;;  %v948_v16 = vld [vmem:[%s1295_s1 + $0x78] ss:$12 sps:$4 sm:$0xff]   ;;  %v951_v19 = vld [vmem:[%s1295_s1 + $0x90] ss:$12 sps:$4 sm:$0xff]  }
   0x7   :  { %275 = vmatpush1.bf16.msra.mxu0 %v936_v4  ;;  %896 = vmatprep.subr.bf16.mxu1 %v958_v13  ;;  %v949_v17 = vld [vmem:[%s1295_s1 + $0x94] ss:$12 sps:$4 sm:$0xff]   ;;  %v952_v20 = vld [vmem:[%s1295_s1 + $0xac] ss:$12 sps:$4 sm:$0xff]   ;;  %v967_v25 = vld [vmem:[%s1295_s1 + $0xb0] ss:$12 sps:$4 sm:$0xff]  }
   0x8   :  { %276 = vmatprep.subr.bf16.mxu0 %v937_v5  ;;  %v962_v21 = vld [vmem:[%s1295_s1 + $0x68] ss:$12 sps:$4 sm:$0xff]   ;;  %v964_v23 = vld [vmem:[%s1295_s1 + $0x80] ss:$12 sps:$4 sm:$0xff]   ;;  %v965_v24 = vld [vmem:[%s1295_s1 + $0x98] ss:$12 sps:$4 sm:$0xff]  }
   0x9   :  { %v954_v22 = vld [vmem:[%s1295_s1 + $0xa8] ss:$12 sps:$4 sm:$0xff]   ;;  %v963_v28 = vld [vmem:[%s1296_s0 + $0x18] sm:$0xff]   ;;  %v966_v29 = vld [vmem:[%s1296_s0 + $0x20] sm:$0xff]   ;;  %v71_v37 = vsub.s32 0, %v70_v36  ;;  %v75_v39 = vsub.s32 1, %v70_v36 }
   0xa   :  { %897 = vmatpush3.bf16.msra.mxu1 %v958_v13  ;;  %v957_v26 = vld [vmem:[%s1296_s0 + $0x8] sm:$0xff]   ;;  %v960_v27 = vld [vmem:[%s1296_s0 + $0x10] sm:$0xff]   ;;  %v970_v32 = vld [vmem:[%s1296_s0 + $0x38] sm:$0xff]   ;;  %v79_v51 = vsub.s32 2, %v70_v36 }
   0xb   :  { %277 = vmatpush1.bf16.msra.mxu0 %v939_v6  ;;  %898 = vmatprep.subr.bf16.mxu1 %v959_v15  ;;  %v968_v30 = vld [vmem:[%s1296_s0 + $0x28] sm:$0xff]   ;;  %v969_v31 = vld [vmem:[%s1296_s0 + $0x30] sm:$0xff]   ;;  %v971_v33 = vld [vmem:[%s1296_s0 + $0x40] sm:$0xff]  }
   0xc   :  { %278 = vmatprep.subr.bf16.mxu0 %v940_v7  ;;  %v972_v34 = vld [vmem:[%s1296_s0 + $0x48] sm:$0xff]   ;;  %v67_v38 = vld [vmem:[%s1297_s2] sm:$0x7] }
   0xd   :  { %v1109_v40 = vrot.slane %v67_v38, %v71_v37  ;;  %v1111_v41 = vrot.slane %v67_v38, %v75_v39  ;;  %v1124_v56 = vrot.slane %v67_v38, %v79_v51 }
   0xe   :  { %899 = vmatpush3.bf16.msra.mxu1 %v959_v15 }
   0xf   :  { %279 = vmatpush1.bf16.msra.mxu0 %v942_v8  ;;  %900 = vmatprep.subr.bf16.mxu1 %v961_v18 }
  0x10   :  { %280 = vmatprep.subr.bf16.mxu0 %v943_v9 }
  0x12   :  { %901 = vmatpush3.bf16.msra.mxu1 %v961_v18 }
  0x13   :  { %281 = vmatpush1.bf16.msra.mxu0 %v945_v12  ;;  %902 = vmatprep.subr.bf16.mxu1 %v962_v21 }
  0x14   :  { %282 = vmatprep.subr.bf16.mxu0 %v946_v14 }
  0x16   :  { %903 = vmatpush3.bf16.msra.mxu1 %v962_v21 }
  0x17   :  { %283 = vmatpush1.bf16.msra.mxu0 %v948_v16  ;;  %904 = vmatprep.subr.bf16.mxu1 %v964_v23 }
  0x18   :  { %284 = vmatprep.subr.bf16.mxu0 %v949_v17 }
  0x1a   :  { %905 = vmatpush3.bf16.msra.mxu1 %v964_v23 }
  0x1b   :  { %285 = vmatpush1.bf16.msra.mxu0 %v951_v19  ;;  %906 = vmatprep.subr.bf16.mxu1 %v965_v24 }
  0x1c   :  { %286 = vmatprep.subr.bf16.mxu0 %v952_v20 }
  0x1e   :  { %907 = vmatpush3.bf16.msra.mxu1 %v965_v24 }
  0x1f   :  { %287 = vmatpush1.bf16.msra.mxu0 %v954_v22  ;;  %908 = vmatprep.subr.bf16.mxu1 %v967_v25 }
  0x22   :  { %305 = vmatmul.mubr.bf16.vlgmr.msra.gmra.mrb[0].mxu0 %v955_v10  ;;  %909 = vmatpush3.bf16.msra.mxu1 %v967_v25 }
  0x23   :  { %314 = vmatprep.mubr.bf16.mxu0 %v973_v1 }
  0x25   :  { %911 = vmatmul.mubr.bf16.vlgmr.msra.gmra.mrb[0].mxu1 %v957_v26 }
  0x26   :  { %914 = vmatprep.mubr.bf16.mxu1 %v960_v27 }
  0x2a   :  { %315 = vmatmul.mubr.bf16.gmra.mrb[4].mxu0 %v957_v26 }
  0x2b   :  { %324 = vmatprep.mubr.bf16.mxu0 %v973_v1 }
  0x2d   :  { %915 = vmatmul.mubr.bf16.gmra.mrb[4].mxu1 %v963_v28 }
  0x2e   :  { %918 = vmatprep.mubr.bf16.mxu1 %v966_v29 }
  0x32   :  { %325 = vmatmul.mubr.bf16.gmra.mrb[8].mxu0 %v960_v27 }
  0x33   :  { %334 = vmatprep.mubr.bf16.mxu0 %v973_v1 }
  0x35   :  { %919 = vmatmul.mubr.bf16.gmra.mrb[8].mxu1 %v968_v30 }
  0x36   :  { %922 = vmatprep.mubr.bf16.mxu1 %v969_v31 }
  0x3a   :  { %335 = vmatmul.mubr.bf16.gmra.mrb[12].mxu0 %v963_v28 }
  0x3b   :  { %344 = vmatprep.mubr.bf16.mxu0 %v973_v1 }
  0x3d   :  { %923 = vmatmul.mubr.bf16.gmra.mrb[12].mxu1 %v970_v32 }
  0x3e   :  { %926 = vmatprep.mubr.bf16.mxu1 %v971_v33 }
  0x42   :  { %345 = vmatmul.mubr.bf16.gmra.mrb[16].mxu0 %v966_v29 }
  0x43   :  { %354 = vmatprep.mubr.bf16.mxu0 %v973_v1 }
  0x45   :  { %927 = vmatmul.mubr.bf16.gmra.mrb[16].mxu1 %v972_v34 }
  0x4a   :  { %355 = vmatmul.mubr.bf16.gmra.mrb[20].mxu0 %v968_v30 }
  0x4b   :  { %364 = vmatprep.mubr.bf16.mxu0 %v973_v1 }
  0x52   :  { %365 = vmatmul.mubr.bf16.gmra.mrb[24].mxu0 %v969_v31 }
  0x53   :  { %374 = vmatprep.mubr.bf16.mxu0 %v973_v1 }
  0x5a   :  { %375 = vmatmul.mubr.bf16.gmra.mrb[28].mxu0 %v970_v32 }
  0x5b   :  { %384 = vmatprep.mubr.bf16.mxu0 %v973_v1 }
  0x62   :  { %385 = vmatmul.mubr.bf16.gmra.mrb[32].mxu0 %v971_v33 }
  0x63   :  { %394 = vmatprep.mubr.bf16.mxu0 %v973_v1 }
  0x6a   :  { %395 = vmatmul.mubr.bf16.gmra.mrb[36].mxu0 %v972_v34 }
  0xf5   :  { %v306_v42 = vpop.f32.mrb[0].mxu0 }
  0xf6   :  { %v307_v43 = vadd.f32 %v306_v42, %v1109_v40  ;;  %v308_v44 = vpop.f32.mrb[1].mxu0 }
  0xf7   :  { %v309_v45 = vadd.f32 %v308_v44, %v1111_v41  ;;  %v310_v46 = vpop.f32.mrb[2].mxu0 }
  0xf8   :  { %v311_v47 = vadd.f32 %v310_v46, %v1109_v40  ;;  %v312_v48 = vpop.f32.mrb[3].mxu0  ;;  %v912_v63 = vpop.f32.mrb[0].mxu1 }
  0xf9   :  { %v836_v49 = vpack.c.bf16 %v309_v45, %v307_v43  ;;  %v313_v50 = vadd.f32 %v312_v48, %v1111_v41  ;;  %v448_v0 = vadd.f32 %v912_v63, %v1124_v56  ;;  %v439_v1 = vpop.f32.mrb[1].mxu1 }
  0xfa   :  { %v440_v3 = vadd.f32 %v439_v1, %v1124_v56  ;;  %v913_v4 = vpop.f32.mrb[2].mxu1 }
  0xfb   :  { %718 = vst [vmem:[%s1298_s3] sm:$0xff] %v836_v49  ;;  %v838_v52 = vpack.c.bf16 %v313_v50, %v311_v47  ;;  %v841_v5 = vpack.c.bf16 %v448_v0, %v448_v0  ;;  %v451_v6 = vadd.f32 %v913_v4, %v1124_v56  ;;  %v442_v7 = vpop.f32.mrb[3].mxu1 }
  0xfc   :  { %v837_v9 = vpack.c.bf16 %v440_v3, %v440_v3  ;;  %v443_v10 = vadd.f32 %v442_v7, %v1124_v56 }
  0xfd   :  { %720 = vst [vmem:[%s1298_s3 + $0xc] sm:$0xff] %v838_v52  ;;  %v316_v53 = vpop.f32.mrb[4].mxu0  ;;  %723 = vst [vmem:[%s1298_s3 + $0x20] sm:$0xf] %v841_v5  ;;  %v843_v13 = vpack.c.bf16 %v451_v6, %v451_v6 }
  0xfe   :  { %v317_v54 = vadd.f32 %v316_v53, %v1109_v40  ;;  %v318_v55 = vpop.f32.mrb[5].mxu0  ;;  %719 = vst [vmem:[%s1298_s3 + $0x8] sm:$0xf] %v837_v9  ;;  %v839_v16 = vpack.c.bf16 %v443_v10, %v443_v10 }
  0xff   :  { %v319_v57 = vadd.f32 %v318_v55, %v1111_v41  ;;  %v320_v58 = vpop.f32.mrb[6].mxu0  ;;  %725 = vst [vmem:[%s1298_s3 + $0x2c] sm:$0xf] %v843_v13 }
 0x100   :  { %v321_v59 = vadd.f32 %v320_v58, %v1109_v40  ;;  %v322_v60 = vpop.f32.mrb[7].mxu0  ;;  %721 = vst [vmem:[%s1298_s3 + $0x14] sm:$0xf] %v839_v16  ;;  %v916_v21 = vpop.f32.mrb[4].mxu1 }
 0x101   :  { %v840_v61 = vpack.c.bf16 %v319_v57, %v317_v54  ;;  %v323_v62 = vadd.f32 %v322_v60, %v1111_v41  ;;  %v464_v22 = vadd.f32 %v916_v21, %v1124_v56  ;;  %v455_v23 = vpop.f32.mrb[5].mxu1 }
 0x102   :  { %v456_v25 = vadd.f32 %v455_v23, %v1124_v56  ;;  %v917_v26 = vpop.f32.mrb[6].mxu1 }
 0x103   :  { %722 = vst [vmem:[%s1298_s3 + $0x18] sm:$0xff] %v840_v61  ;;  %v842_v2 = vpack.c.bf16 %v323_v62, %v321_v59  ;;  %v849_v27 = vpack.c.bf16 %v464_v22, %v464_v22  ;;  %v467_v28 = vadd.f32 %v917_v26, %v1124_v56  ;;  %v458_v29 = vpop.f32.mrb[7].mxu1 }
 0x104   :  { %v845_v31 = vpack.c.bf16 %v456_v25, %v456_v25  ;;  %v459_v32 = vadd.f32 %v458_v29, %v1124_v56 }
 0x105   :  { %724 = vst [vmem:[%s1298_s3 + $0x24] sm:$0xff] %v842_v2  ;;  %v326_v8 = vpop.f32.mrb[8].mxu0  ;;  %731 = vst [vmem:[%s1298_s3 + $0x50] sm:$0xf] %v849_v27  ;;  %v851_v35 = vpack.c.bf16 %v467_v28, %v467_v28 }
 0x106   :  { %v327_v11 = vadd.f32 %v326_v8, %v1109_v40  ;;  %v328_v12 = vpop.f32.mrb[9].mxu0  ;;  %727 = vst [vmem:[%s1298_s3 + $0x38] sm:$0xf] %v845_v31  ;;  %v847_v38 = vpack.c.bf16 %v459_v32, %v459_v32 }
 0x107   :  { %v329_v14 = vadd.f32 %v328_v12, %v1111_v41  ;;  %v330_v15 = vpop.f32.mrb[10].mxu0  ;;  %733 = vst [vmem:[%s1298_s3 + $0x5c] sm:$0xf] %v851_v35 }
 0x108   :  { %v331_v17 = vadd.f32 %v330_v15, %v1109_v40  ;;  %v332_v18 = vpop.f32.mrb[11].mxu0  ;;  %729 = vst [vmem:[%s1298_s3 + $0x44] sm:$0xf] %v847_v38  ;;  %v920_v45 = vpop.f32.mrb[8].mxu1 }
 0x109   :  { %v844_v19 = vpack.c.bf16 %v329_v14, %v327_v11  ;;  %v333_v20 = vadd.f32 %v332_v18, %v1111_v41  ;;  %v480_v46 = vadd.f32 %v920_v45, %v1124_v56  ;;  %v471_v47 = vpop.f32.mrb[9].mxu1 }
 0x10a   :  { %v472_v49 = vadd.f32 %v471_v47, %v1124_v56  ;;  %v921_v50 = vpop.f32.mrb[10].mxu1 }
 0x10b   :  { %726 = vst [vmem:[%s1298_s3 + $0x30] sm:$0xff] %v844_v19  ;;  %v846_v24 = vpack.c.bf16 %v333_v20, %v331_v17  ;;  %v857_v51 = vpack.c.bf16 %v480_v46, %v480_v46  ;;  %v483_v52 = vadd.f32 %v921_v50, %v1124_v56  ;;  %v474_v53 = vpop.f32.mrb[11].mxu1 }
 0x10c   :  { %v853_v55 = vpack.c.bf16 %v472_v49, %v472_v49  ;;  %v475_v57 = vadd.f32 %v474_v53, %v1124_v56 }
 0x10d   :  { %728 = vst [vmem:[%s1298_s3 + $0x3c] sm:$0xff] %v846_v24  ;;  %v336_v30 = vpop.f32.mrb[12].mxu0  ;;  %739 = vst [vmem:[%s1298_s3 + $0x80] sm:$0xf] %v857_v51  ;;  %v859_v60 = vpack.c.bf16 %v483_v52, %v483_v52 }
 0x10e   :  { %v337_v33 = vadd.f32 %v336_v30, %v1109_v40  ;;  %v338_v34 = vpop.f32.mrb[13].mxu0  ;;  %735 = vst [vmem:[%s1298_s3 + $0x68] sm:$0xf] %v853_v55  ;;  %v855_v63 = vpack.c.bf16 %v475_v57, %v475_v57 }
 0x10f   :  { %v339_v36 = vadd.f32 %v338_v34, %v1111_v41  ;;  %v340_v37 = vpop.f32.mrb[14].mxu0  ;;  %741 = vst [vmem:[%s1298_s3 + $0x8c] sm:$0xf] %v859_v60 }
 0x110   :  { %v341_v39 = vadd.f32 %v340_v37, %v1109_v40  ;;  %v342_v42 = vpop.f32.mrb[15].mxu0  ;;  %737 = vst [vmem:[%s1298_s3 + $0x74] sm:$0xf] %v855_v63  ;;  %v924_v4 = vpop.f32.mrb[12].mxu1 }
 0x111   :  { %v848_v43 = vpack.c.bf16 %v339_v36, %v337_v33  ;;  %v343_v44 = vadd.f32 %v342_v42, %v1111_v41  ;;  %v496_v5 = vadd.f32 %v924_v4, %v1124_v56  ;;  %v487_v6 = vpop.f32.mrb[13].mxu1 }
 0x112   :  { %v488_v8 = vadd.f32 %v487_v6, %v1124_v56  ;;  %v925_v9 = vpop.f32.mrb[14].mxu1 }
 0x113   :  { %730 = vst [vmem:[%s1298_s3 + $0x48] sm:$0xff] %v848_v43  ;;  %v850_v48 = vpack.c.bf16 %v343_v44, %v341_v39  ;;  %v865_v10 = vpack.c.bf16 %v496_v5, %v496_v5  ;;  %v499_v11 = vadd.f32 %v925_v9, %v1124_v56  ;;  %v490_v12 = vpop.f32.mrb[15].mxu1 }
 0x114   :  { %v861_v14 = vpack.c.bf16 %v488_v8, %v488_v8  ;;  %v491_v15 = vadd.f32 %v490_v12, %v1124_v56 }
 0x115   :  { %732 = vst [vmem:[%s1298_s3 + $0x54] sm:$0xff] %v850_v48  ;;  %v346_v54 = vpop.f32.mrb[16].mxu0  ;;  %747 = vst [vmem:[%s1298_s3 + $0xb0] sm:$0xf] %v865_v10  ;;  %v867_v18 = vpack.c.bf16 %v499_v11, %v499_v11 }
 0x116   :  { %v347_v58 = vadd.f32 %v346_v54, %v1109_v40  ;;  %v348_v59 = vpop.f32.mrb[17].mxu0  ;;  %743 = vst [vmem:[%s1298_s3 + $0x98] sm:$0xf] %v861_v14  ;;  %v863_v21 = vpack.c.bf16 %v491_v15, %v491_v15 }
 0x117   :  { %v349_v61 = vadd.f32 %v348_v59, %v1111_v41  ;;  %v350_v62 = vpop.f32.mrb[18].mxu0  ;;  %749 = vst [vmem:[%s1298_s3 + $0xbc] sm:$0xf] %v867_v18 }
 0x118   :  { %v351_v0 = vadd.f32 %v350_v62, %v1109_v40  ;;  %v352_v1 = vpop.f32.mrb[19].mxu0  ;;  %745 = vst [vmem:[%s1298_s3 + $0xa4] sm:$0xf] %v863_v21  ;;  %v928_v26 = vpop.f32.mrb[16].mxu1 }
 0x119   :  { %v852_v2 = vpack.c.bf16 %v349_v61, %v347_v58  ;;  %v353_v3 = vadd.f32 %v352_v1, %v1111_v41  ;;  %v512_v27 = vadd.f32 %v928_v26, %v1124_v56  ;;  %v503_v28 = vpop.f32.mrb[17].mxu1 }
 0x11a   :  { %v504_v30 = vadd.f32 %v503_v28, %v1124_v56  ;;  %v929_v31 = vpop.f32.mrb[18].mxu1 }
 0x11b   :  { %734 = vst [vmem:[%s1298_s3 + $0x60] sm:$0xff] %v852_v2  ;;  %v854_v7 = vpack.c.bf16 %v353_v3, %v351_v0  ;;  %v873_v32 = vpack.c.bf16 %v512_v27, %v512_v27  ;;  %v515_v33 = vadd.f32 %v929_v31, %v1124_v56  ;;  %v506_v34 = vpop.f32.mrb[19].mxu1 }
 0x11c   :  { %v869_v36 = vpack.c.bf16 %v504_v30, %v504_v30  ;;  %v507_v37 = vadd.f32 %v506_v34, %v1124_v56 }
 0x11d   :  { %736 = vst [vmem:[%s1298_s3 + $0x6c] sm:$0xff] %v854_v7  ;;  %v356_v13 = vpop.f32.mrb[20].mxu0  ;;  %755 = vst [vmem:[%s1298_s3 + $0xe0] sm:$0xf] %v873_v32  ;;  %v875_v42 = vpack.c.bf16 %v515_v33, %v515_v33 }
 0x11e   :  { %v357_v16 = vadd.f32 %v356_v13, %v1109_v40  ;;  %v358_v17 = vpop.f32.mrb[21].mxu0  ;;  %751 = vst [vmem:[%s1298_s3 + $0xc8] sm:$0xf] %v869_v36  ;;  %v871_v45 = vpack.c.bf16 %v507_v37, %v507_v37 }
 0x11f   :  { %v359_v19 = vadd.f32 %v358_v17, %v1111_v41  ;;  %v360_v20 = vpop.f32.mrb[22].mxu0  ;;  %757 = vst [vmem:[%s1298_s3 + $0xec] sm:$0xf] %v875_v42 }
 0x120   :  { %v361_v22 = vadd.f32 %v360_v20, %v1109_v40  ;;  %v362_v23 = vpop.f32.mrb[23].mxu0  ;;  %753 = vst [vmem:[%s1298_s3 + $0xd4] sm:$0xf] %v871_v45 }
 0x121   :  { %v856_v24 = vpack.c.bf16 %v359_v19, %v357_v16  ;;  %v363_v25 = vadd.f32 %v362_v23, %v1111_v41 }
 0x123   :  { %738 = vst [vmem:[%s1298_s3 + $0x78] sm:$0xff] %v856_v24  ;;  %v858_v29 = vpack.c.bf16 %v363_v25, %v361_v22 }
 0x125   :  { %740 = vst [vmem:[%s1298_s3 + $0x84] sm:$0xff] %v858_v29  ;;  %v366_v35 = vpop.f32.mrb[24].mxu0 }
 0x126   :  { %v367_v38 = vadd.f32 %v366_v35, %v1109_v40  ;;  %v368_v39 = vpop.f32.mrb[25].mxu0 }
 0x127   :  { %v369_v43 = vadd.f32 %v368_v39, %v1111_v41  ;;  %v370_v44 = vpop.f32.mrb[26].mxu0 }
 0x128   :  { %v371_v46 = vadd.f32 %v370_v44, %v1109_v40  ;;  %v372_v47 = vpop.f32.mrb[27].mxu0 }
 0x129   :  { %v860_v56 = vpack.c.bf16 %v369_v43, %v367_v38  ;;  %v373_v48 = vadd.f32 %v372_v47, %v1111_v41 }
 0x12b   :  { %742 = vst [vmem:[%s1298_s3 + $0x90] sm:$0xff] %v860_v56  ;;  %v862_v49 = vpack.c.bf16 %v373_v48, %v371_v46 }
 0x12d   :  { %744 = vst [vmem:[%s1298_s3 + $0x9c] sm:$0xff] %v862_v49  ;;  %v376_v50 = vpop.f32.mrb[28].mxu0 }
 0x12e   :  { %v377_v51 = vadd.f32 %v376_v50, %v1109_v40  ;;  %v378_v52 = vpop.f32.mrb[29].mxu0 }
 0x12f   :  { %v379_v53 = vadd.f32 %v378_v52, %v1111_v41  ;;  %v380_v54 = vpop.f32.mrb[30].mxu0 }
 0x130   :  { %v381_v55 = vadd.f32 %v380_v54, %v1109_v40  ;;  %v382_v57 = vpop.f32.mrb[31].mxu0 }
 0x131   :  { %v864_v58 = vpack.c.bf16 %v379_v53, %v377_v51  ;;  %v383_v59 = vadd.f32 %v382_v57, %v1111_v41 }
 0x133   :  { %746 = vst [vmem:[%s1298_s3 + $0xa8] sm:$0xff] %v864_v58  ;;  %v866_v60 = vpack.c.bf16 %v383_v59, %v381_v55 }
 0x135   :  { %748 = vst [vmem:[%s1298_s3 + $0xb4] sm:$0xff] %v866_v60  ;;  %v386_v61 = vpop.f32.mrb[32].mxu0 }
 0x136   :  { %v387_v62 = vadd.f32 %v386_v61, %v1109_v40  ;;  %v388_v63 = vpop.f32.mrb[33].mxu0 }
 0x137   :  { %v389_v0 = vadd.f32 %v388_v63, %v1111_v41  ;;  %v390_v1 = vpop.f32.mrb[34].mxu0 }
 0x138   :  { %v391_v2 = vadd.f32 %v390_v1, %v1109_v40  ;;  %v392_v3 = vpop.f32.mrb[35].mxu0 }
 0x139   :  { %v868_v4 = vpack.c.bf16 %v389_v0, %v387_v62  ;;  %v393_v5 = vadd.f32 %v392_v3, %v1111_v41 }
 0x13b   :  { %750 = vst [vmem:[%s1298_s3 + $0xc0] sm:$0xff] %v868_v4  ;;  %v870_v6 = vpack.c.bf16 %v393_v5, %v391_v2 }
 0x13d   :  { %752 = vst [vmem:[%s1298_s3 + $0xcc] sm:$0xff] %v870_v6  ;;  %v396_v7 = vpop.f32.mrb[36].mxu0 }
 0x13e   :  { %v397_v8 = vadd.f32 %v396_v7, %v1109_v40  ;;  %v398_v9 = vpop.f32.mrb[37].mxu0 }
 0x13f   :  { %v399_v10 = vadd.f32 %v398_v9, %v1111_v41  ;;  %v400_v11 = vpop.f32.mrb[38].mxu0 }
 0x140   :  { %v401_v12 = vadd.f32 %v400_v11, %v1109_v40  ;;  %v402_v13 = vpop.f32.mrb[39].mxu0 }
 0x141   :  { %v872_v14 = vpack.c.bf16 %v399_v10, %v397_v8  ;;  %v403_v15 = vadd.f32 %v402_v13, %v1111_v41 }
 0x143   :  { %754 = vst [vmem:[%s1298_s3 + $0xd8] sm:$0xff] %v872_v14  ;;  %v874_v16 = vpack.c.bf16 %v403_v15, %v401_v12 }
 0x145   :  { %756 = vst [vmem:[%s1298_s3 + $0xe4] sm:$0xff] %v874_v16 }

// kernel: multi_head_dot_product_attention.4
= control target key start
LH: loop header
LB: loop body
LE: loop exit
PB: predicated region body
PF: predicated region fallthrough
CT: control target
= control target key end

     0   :  { %s2742_s12 = smov 0   ;;  %s2744_s13 = smov 0   ;;  %s3643_s0 = inlined_call_operand.vmem [shape: bf16[2,2,80,64], index: 0, kind: input, shape index: {}]   ;;  %s3644_s1 = inlined_call_operand.vmem [shape: bf16[2,2,80,64], index: 1, kind: input, shape index: {}]   ;;  %s3645_s2 = inlined_call_operand.vmem [shape: bf16[2,2,80,64], index: 2, kind: input, shape index: {}]   ;;  %s3646_s3 = inlined_call_operand.vmem [shape: bf16[2,80,128], index: 3, kind: output, shape index: {}]  }
   0x1   :  { %s2746_s14 = smov 0  }
   0x2 LB: > { %s39_s15 = sadd.s32 1, %s2711_s13  ;;  %p2219_p0 = scmp.ge.s32.totalorder %s2715_s14, 1  ;;  %s2715_s14 = sphi %s2746_s14, %s13_s14   ;;  %s2711_s13 = sphi %s2744_s13, %s3680_s13   ;;  %s2707_s12 = sphi %s2742_s12, %s3679_s12  }
   0x3   : > { %p41_p1 = scmp.ge.s32.totalorder %s39_s15, 2  ;;  %p232_p2 = scmp.lt.s32.totalorder %s2715_s14, 3 }
   0x5   : > { %s3682_s15 = smov (%p41_p1, %s39_s15), 0  ;;  %p233_p3 = pnand %p2219_p0, %p232_p2 }
   0x7   : > { %236 = sbr.rel (%p233_p3) target bundleno = 1110 (0x456), region = 32 }
   0xe   : > { %p302_p4 = scmp.lt.s32.totalorder %s2707_s12, 1  ;;  %vm407_vm0 = vcmask 523264   ;;  %v3651_v0 = vmov 0.0   ;;  %vm2718_vm1 = vmmov 0   ;;  %vm366_vm2 = vcmask 7168   ;;  %s2721_s26 = smov 64  }
   0xf   : > { %2395 = vmatprep.subr.bf16.mxu1 %v3651_v0  ;;  %2365 = vmatprep.subr.bf16.mxu0 %v3651_v0  ;;  %408 = vst.msk [vmem:[#allocation4] sm:$0xff] %vm407_vm0, %v3651_v0  ;;  %409 = vst.msk [vmem:[#allocation4 + $0x8] sm:$0xff] %vm407_vm0, %v3651_v0  ;;  %v2719_v31 = vmov -inf   ;;  %v799_v32 = vlaneseq  ;;  %vm887_vm4 = vcmask 654336  }
  0x10   : > { %410 = vst.msk [vmem:[#allocation4 + $0x10] sm:$0xff] %vm407_vm0, %v3651_v0  ;;  %411 = vst.msk [vmem:[#allocation4 + $0x18] sm:$0xff] %vm407_vm0, %v3651_v0  ;;  %s3684_s12 = smov (!%p302_p4, %s2707_s12), 1  ;;  %2405 = vmatprep.mubr.msk.bf16.mxu1 %vm2718_vm1, %v3651_v0  ;;  %2375 = vmatprep.mubr.msk.bf16.mxu0 %vm2718_vm1, %v3651_v0 }
  0x11   : > { %412 = vst.msk [vmem:[#allocation4 + $0x20] sm:$0xff] %vm407_vm0, %v3651_v0  ;;  %413 = vst.msk [vmem:[#allocation4 + $0x28] sm:$0xff] %vm407_vm0, %v3651_v0  ;;  %s2815_s16 = smul.u32 80, %s3684_s12  ;;  %v2959_v33 = vand.u32 127, %v799_v32 }
  0x12   : > { %414 = vst.msk [vmem:[#allocation4 + $0x30] sm:$0xff] %vm407_vm0, %v3651_v0  ;;  %415 = vst.msk [vmem:[#allocation4 + $0x38] sm:$0xff] %vm407_vm0, %v3651_v0  ;;  %s2486_s27 = smul.u32 40, %s3684_s12 }
  0x13   : > { %416 = vst.msk [vmem:[#allocation4 + $0x40] sm:$0xff] %vm407_vm0, %v3651_v0  ;;  %417 = vst.msk [vmem:[#allocation4 + $0x48] sm:$0xff] %vm407_vm0, %v3651_v0  ;;  %s2821_s19 = scalar_lea.vmem %s3644_s1, %s2815_s16  ;;  %s2837_s22 = scalar_lea.vmem %s3643_s0, %s2815_s16  ;;  %vm803_vm3 = vcmp.lt.s32.totalorder %v2959_v33, 77 }
  0x14   : > { %418 = vst.msk [vmem:[#allocation4 + $0x50] sm:$0xff] %vm407_vm0, %v3651_v0  ;;  %419 = vst.msk [vmem:[#allocation4 + $0x58] sm:$0xff] %vm407_vm0, %v3651_v0  ;;  %v2543_v1 = vld [vmem:[%s2821_s19 + $0x28] sm:$0xff]   ;;  %v2544_v2 = vld [vmem:[%s2821_s19] sm:$0xff]   ;;  %s3108_s25 = scalar_lea.vmem %s3645_s2, %s2815_s16  ;;  %s3617_s30 = scalar_lea.vmem %s3646_s3, %s2486_s27 }
  0x15   : > { %420 = vst.msk [vmem:[#allocation4 + $0x60] sm:$0xff] %vm407_vm0, %v3651_v0  ;;  %421 = vst.msk [vmem:[#allocation4 + $0x68] sm:$0xff] %vm407_vm0, %v3651_v0  ;;  %v708_v3 = vsel %vm407_vm0, %v2543_v1, 0  ;;  %v555_v4 = vsel %vm407_vm0, %v2544_v2, 0  ;;  %v2545_v5 = vld [vmem:[%s2821_s19 + $0x30] sm:$0xff]   ;;  %v2546_v6 = vld [vmem:[%s2821_s19 + $0x8] sm:$0xff]  }
  0x16   : > { %422 = vst.msk [vmem:[#allocation4 + $0x70] sm:$0xff] %vm407_vm0, %v3651_v0  ;;  %423 = vst.msk [vmem:[#allocation4 + $0x78] sm:$0xff] %vm407_vm0, %v3651_v0  ;;  %2396 = vmatpush3.bf16.xpose.msra.mxu1 %v708_v3  ;;  %2366 = vmatpush3.bf16.xpose.msra.mxu0 %v555_v4  ;;  %v711_v7 = vsel %vm407_vm0, %v2545_v5, 0  ;;  %v558_v8 = vsel %vm407_vm0, %v2546_v6, 0  ;;  %v2547_v9 = vld [vmem:[%s2821_s19 + $0x38] sm:$0xff]   ;;  %v2548_v10 = vld [vmem:[%s2821_s19 + $0x10] sm:$0xff]  }
  0x17   : > { %424 = vst.msk [vmem:[#allocation4 + $0x80] sm:$0xff] %vm407_vm0, %v3651_v0  ;;  %425 = vst.msk [vmem:[#allocation4 + $0x88] sm:$0xff] %vm407_vm0, %v3651_v0  ;;  %2397 = vmatprep.subr.bf16.mxu1 %v3651_v0  ;;  %2367 = vmatprep.subr.bf16.mxu0 %v3651_v0  ;;  %v714_v11 = vsel %vm407_vm0, %v2547_v9, 0  ;;  %v561_v12 = vsel %vm407_vm0, %v2548_v10, 0  ;;  %v2549_v13 = vld [vmem:[%s2821_s19 + $0x40] sm:$0xff]   ;;  %v2550_v14 = vld [vmem:[%s2821_s19 + $0x18] sm:$0xff]  }
  0x18   : > { %426 = vst.msk [vmem:[#allocation4 + $0x90] sm:$0xff] %vm407_vm0, %v3651_v0  ;;  %427 = vst.msk [vmem:[#allocation4 + $0x98] sm:$0xff] %vm407_vm0, %v3651_v0  ;;  %v717_v15 = vsel %vm407_vm0, %v2549_v13, 0  ;;  %v564_v16 = vsel %vm407_vm0, %v2550_v14, 0  ;;  %v2551_v17 = vld [vmem:[%s2821_s19 + $0x48] sm:$0xff]   ;;  %v2552_v18 = vld [vmem:[%s2821_s19 + $0x20] sm:$0xff]  }
  0x19   : > { %v720_v19 = vsel %vm407_vm0, %v2551_v17, 0  ;;  %v567_v20 = vsel %vm407_vm0, %v2552_v18, 0  ;;  %v2553_v21 = vld [vmem:[%s2837_s22 + $0x28] sm:$0xff]   ;;  %v2554_v22 = vld [vmem:[%s2837_s22] sm:$0xff]   ;;  %v2555_v23 = vld [vmem:[%s2837_s22 + $0x30] sm:$0xff]   ;;  %377 = vst.msk [vmem:[#allocation2 + $0x50] sm:$0xff] %vm366_vm2, %v2719_v31 }
  0x1a   : > { %v2556_v24 = vld [vmem:[%s2837_s22 + $0x8] sm:$0xff]   ;;  %v2557_v25 = vld [vmem:[%s2837_s22 + $0x38] sm:$0xff]   ;;  %v2558_v26 = vld [vmem:[%s2837_s22 + $0x10] sm:$0xff]   ;;  %367 = vst.msk [vmem:[#allocation2] sm:$0xff] %vm366_vm2, %v2719_v31 }
  0x1b   : > { %v2559_v27 = vld [vmem:[%s2837_s22 + $0x40] sm:$0xff]   ;;  %v2560_v28 = vld [vmem:[%s2837_s22 + $0x18] sm:$0xff]   ;;  %v2561_v29 = vld [vmem:[%s2837_s22 + $0x48] sm:$0xff]   ;;  %368 = vst.msk [vmem:[#allocation2 + $0x8] sm:$0xff] %vm366_vm2, %v2719_v31 }
  0x1c   : > { %v2562_v30 = vld [vmem:[%s2837_s22 + $0x20] sm:$0xff]   ;;  %369 = vst.msk [vmem:[#allocation2 + $0x10] sm:$0xff] %vm366_vm2, %v2719_v31  ;;  %370 = vst.msk [vmem:[#allocation2 + $0x18] sm:$0xff] %vm366_vm2, %v2719_v31 }
  0x1d   : > { %371 = vst.msk [vmem:[#allocation2 + $0x20] sm:$0xff] %vm366_vm2, %v2719_v31  ;;  %372 = vst.msk [vmem:[#allocation2 + $0x28] sm:$0xff] %vm366_vm2, %v2719_v31 }
  0x1e   : > { %2398 = vmatpush3.bf16.xpose.msra.mxu1 %v711_v7  ;;  %2368 = vmatpush3.bf16.xpose.msra.mxu0 %v558_v8  ;;  %373 = vst.msk [vmem:[#allocation2 + $0x30] sm:$0xff] %vm366_vm2, %v2719_v31  ;;  %374 = vst.msk [vmem:[#allocation2 + $0x38] sm:$0xff] %vm366_vm2, %v2719_v31 }
  0x1f   : > { %2399 = vmatprep.subr.bf16.mxu1 %v3651_v0  ;;  %2369 = vmatprep.subr.bf16.mxu0 %v3651_v0  ;;  %375 = vst.msk [vmem:[#allocation2 + $0x40] sm:$0xff] %vm366_vm2, %v2719_v31  ;;  %376 = vst.msk [vmem:[#allocation2 + $0x48] sm:$0xff] %vm366_vm2, %v2719_v31 }
  0x20   : > { %378 = vst.msk [vmem:[#allocation2 + $0x58] sm:$0xff] %vm366_vm2, %v2719_v31  ;;  %379 = vst.msk [vmem:[#allocation2 + $0x60] sm:$0xff] %vm366_vm2, %v2719_v31 }
  0x21   : > { %380 = vst.msk [vmem:[#allocation2 + $0x68] sm:$0xff] %vm366_vm2, %v2719_v31  ;;  %381 = vst.msk [vmem:[#allocation2 + $0x70] sm:$0xff] %vm366_vm2, %v2719_v31 }
  0x22   : > { %382 = vst.msk [vmem:[#allocation2 + $0x78] sm:$0xff] %vm366_vm2, %v2719_v31  ;;  %383 = vst.msk [vmem:[#allocation2 + $0x80] sm:$0xff] %vm366_vm2, %v2719_v31 }
  0x23   : > { %384 = vst.msk [vmem:[#allocation2 + $0x88] sm:$0xff] %vm366_vm2, %v2719_v31  ;;  %385 = vst.msk [vmem:[#allocation2 + $0x90] sm:$0xff] %vm366_vm2, %v2719_v31 }
  0x24   : > { %386 = vst.msk [vmem:[#allocation2 + $0x98] sm:$0xff] %vm366_vm2, %v2719_v31  ;;  %387 = vst.msk [vmem:[#allocation3] sm:$0xff] %vm366_vm2, %v3651_v0 }
  0x25   : > { %388 = vst.msk [vmem:[#allocation3 + $0x8] sm:$0xff] %vm366_vm2, %v3651_v0  ;;  %389 = vst.msk [vmem:[#allocation3 + $0x10] sm:$0xff] %vm366_vm2, %v3651_v0 }
  0x26   : > { %2400 = vmatpush3.bf16.xpose.msra.mxu1 %v714_v11  ;;  %2370 = vmatpush3.bf16.xpose.msra.mxu0 %v561_v12  ;;  %390 = vst.msk [vmem:[#allocation3 + $0x18] sm:$0xff] %vm366_vm2, %v3651_v0  ;;  %391 = vst.msk [vmem:[#allocation3 + $0x20] sm:$0xff] %vm366_vm2, %v3651_v0  ;;  %v2720_v11 = vmov 0  }
  0x27   : > { %2401 = vmatprep.subr.bf16.mxu1 %v3651_v0  ;;  %2371 = vmatprep.subr.bf16.mxu0 %v3651_v0  ;;  %392 = vst.msk [vmem:[#allocation3 + $0x28] sm:$0xff] %vm366_vm2, %v3651_v0  ;;  %393 = vst.msk [vmem:[#allocation3 + $0x30] sm:$0xff] %vm366_vm2, %v3651_v0 }
  0x28   : > { %394 = vst.msk [vmem:[#allocation3 + $0x38] sm:$0xff] %vm366_vm2, %v3651_v0  ;;  %395 = vst.msk [vmem:[#allocation3 + $0x40] sm:$0xff] %vm366_vm2, %v3651_v0  ;;  %2516 = vset.pattern.permute.xlu0 %v2720_v11  ;;  %2517 = vset.pattern.permute.xlu1 %v2720_v11 }
  0x29   : > { %396 = vst.msk [vmem:[#allocation3 + $0x48] sm:$0xff] %vm366_vm2, %v3651_v0  ;;  %397 = vst.msk [vmem:[#allocation3 + $0x50] sm:$0xff] %vm366_vm2, %v3651_v0 }
  0x2a   : > { %398 = vst.msk [vmem:[#allocation3 + $0x58] sm:$0xff] %vm366_vm2, %v3651_v0  ;;  %399 = vst.msk [vmem:[#allocation3 + $0x60] sm:$0xff] %vm366_vm2, %v3651_v0 }
  0x2b   : > { %400 = vst.msk [vmem:[#allocation3 + $0x68] sm:$0xff] %vm366_vm2, %v3651_v0  ;;  %401 = vst.msk [vmem:[#allocation3 + $0x70] sm:$0xff] %vm366_vm2, %v3651_v0 }
  0x2c   : > { %402 = vst.msk [vmem:[#allocation3 + $0x78] sm:$0xff] %vm366_vm2, %v3651_v0  ;;  %403 = vst.msk [vmem:[#allocation3 + $0x80] sm:$0xff] %vm366_vm2, %v3651_v0 }
  0x2d   : > { %404 = vst.msk [vmem:[#allocation3 + $0x88] sm:$0xff] %vm366_vm2, %v3651_v0  ;;  %405 = vst.msk [vmem:[#allocation3 + $0x90] sm:$0xff] %vm366_vm2, %v3651_v0 }
  0x2e   : > { %2402 = vmatpush3.bf16.xpose.msra.mxu1 %v717_v15  ;;  %2372 = vmatpush3.bf16.xpose.msra.mxu0 %v564_v16  ;;  %406 = vst.msk [vmem:[#allocation3 + $0x98] sm:$0xff] %vm366_vm2, %v3651_v0 }
  0x2f   : > { %2403 = vmatprep.subr.bf16.mxu1 %v3651_v0  ;;  %2373 = vmatprep.subr.bf16.mxu0 %v3651_v0 }
  0x36   : > { %2404 = vmatpush3.bf16.xpose.msra.mxu1 %v720_v19  ;;  %2374 = vmatpush3.bf16.xpose.msra.mxu0 %v567_v20 }
  0x37   : > { %2455 = vmatprep.subr.bf16.mxu1 %v3651_v0  ;;  %2425 = vmatprep.subr.bf16.mxu0 %v3651_v0 }
  0x3d   : > { %2406 = vmatmul.mubr.msk.bf16.vlgmr.msra.gmra.mrb[0].mxu1 %vm407_vm0, %v2553_v21  ;;  %2376 = vmatmul.mubr.msk.bf16.vlgmr.msra.gmra.mrb[0].mxu0 %vm407_vm0, %v2554_v22 }
  0x3e   : > { %2409 = vmatprep.mubr.msk.bf16.mxu1 %vm2718_vm1, %v3651_v0  ;;  %2379 = vmatprep.mubr.msk.bf16.mxu0 %vm2718_vm1, %v3651_v0 }
  0x45   : > { %2410 = vmatmul.mubr.msk.bf16.gmra.mrb[4].mxu1 %vm407_vm0, %v2555_v23  ;;  %2380 = vmatmul.mubr.msk.bf16.gmra.mrb[4].mxu0 %vm407_vm0, %v2556_v24 }
  0x46   : > { %2413 = vmatprep.mubr.msk.bf16.mxu1 %vm2718_vm1, %v3651_v0  ;;  %2383 = vmatprep.mubr.msk.bf16.mxu0 %vm2718_vm1, %v3651_v0 }
  0x4d   : > { %2414 = vmatmul.mubr.msk.bf16.gmra.mrb[8].mxu1 %vm407_vm0, %v2557_v25  ;;  %2384 = vmatmul.mubr.msk.bf16.gmra.mrb[8].mxu0 %vm407_vm0, %v2558_v26 }
  0x4e   : > { %2417 = vmatprep.mubr.msk.bf16.mxu1 %vm2718_vm1, %v3651_v0  ;;  %2387 = vmatprep.mubr.msk.bf16.mxu0 %vm2718_vm1, %v3651_v0 }
  0x55   : > { %2418 = vmatmul.mubr.msk.bf16.gmra.mrb[12].mxu1 %vm407_vm0, %v2559_v27  ;;  %2388 = vmatmul.mubr.msk.bf16.gmra.mrb[12].mxu0 %vm407_vm0, %v2560_v28 }
  0x56   : > { %2421 = vmatprep.mubr.msk.bf16.mxu1 %vm2718_vm1, %v3651_v0  ;;  %2391 = vmatprep.mubr.msk.bf16.mxu0 %vm2718_vm1, %v3651_v0 }
  0x5d   : > { %2422 = vmatmul.mubr.msk.bf16.gmra.mrb[16].mxu1 %vm407_vm0, %v2561_v29  ;;  %2392 = vmatmul.mubr.msk.bf16.gmra.mrb[16].mxu0 %vm407_vm0, %v2562_v30 }
  0x5e   : > { %2465 = vmatprep.mubr.msk.bf16.mxu1 %vm2718_vm1, %v3651_v0  ;;  %2435 = vmatprep.mubr.msk.bf16.mxu0 %vm2718_vm1, %v3651_v0 }
 0x110   : > { %v756_v34 = vpop.f32.mrb[0].mxu1  ;;  %v603_v36 = vpop.f32.mrb[0].mxu0 }
 0x111   : > { %v2964_v35 = vsel %vm803_vm3, %v756_v34, -1e+30  ;;  %v2407_v37 = vpop.f32.mrb[1].mxu1  ;;  %v2968_v38 = vsel %vm803_vm3, %v603_v36, -1e+30  ;;  %v2377_v39 = vpop.f32.mrb[1].mxu0 }
 0x112   : > { %v759_v40 = vpop.f32.mrb[2].mxu1  ;;  %v918_v41 = vsel %vm887_vm4, %v2964_v35, -inf  ;;  %v606_v42 = vpop.f32.mrb[2].mxu0  ;;  %v888_v46 = vsel %vm887_vm4, %v2968_v38, -inf }
 0x113   : > { %919 = vmax.xlane.f32.xlu0 %v918_v41  ;;  %v2408_v43 = vpop.f32.mrb[3].mxu1  ;;  %v2974_v44 = vsel %vm803_vm3, %v606_v42, -1e+30  ;;  %v2378_v45 = vpop.f32.mrb[3].mxu0  ;;  %v2982_v48 = vsel %vm803_vm3, %v759_v40, -1e+30 }
 0x114   : > { %v891_v47 = vsel %vm887_vm4, %v2974_v44, -inf  ;;  %v921_v54 = vsel %vm887_vm4, %v2982_v48, -inf }
 0x115   : > { %892 = vmax.xlane.f32.xlu1 %v891_v47 }
 0x117   : > { %889 = vmax.xlane.f32.xlu0 %v888_v46 }
 0x118   : > { %v764_v49 = vpop.f32.mrb[4].mxu1  ;;  %v611_v52 = vpop.f32.mrb[4].mxu0 }
 0x119   : > { %v2986_v50 = vsel %vm803_vm3, %v764_v49, -1e+30  ;;  %v2411_v51 = vpop.f32.mrb[5].mxu1  ;;  %v2994_v56 = vsel %vm803_vm3, %v611_v52, -1e+30  ;;  %v2381_v57 = vpop.f32.mrb[5].mxu0 }
 0x11a   : > { %v767_v53 = vpop.f32.mrb[6].mxu1  ;;  %v924_v55 = vsel %vm887_vm4, %v2986_v50, -inf  ;;  %v614_v60 = vpop.f32.mrb[6].mxu0  ;;  %v894_v62 = vsel %vm887_vm4, %v2994_v56, -inf  ;;  %v3078_v57 = vld [vmem:[#allocation2 + $0x50] sm:$0xff] }
 0x11b   : > { %v2998_v58 = vsel %vm803_vm3, %v767_v53, -1e+30  ;;  %922 = vmax.xlane.f32.xlu0 %v921_v54  ;;  %925 = vmax.xlane.f32.xlu1 %v924_v55  ;;  %v2412_v59 = vpop.f32.mrb[7].mxu1  ;;  %v2382_v63 = vpop.f32.mrb[7].mxu0  ;;  %v3006_v1 = vsel %vm803_vm3, %v614_v60, -1e+30 }
 0x11c   : > { %v927_v61 = vsel %vm887_vm4, %v2998_v58, -inf  ;;  %v897_v3 = vsel %vm887_vm4, %v3006_v1, -inf }
 0x11f   : > { %928 = vmax.xlane.f32.xlu1 %v927_v61  ;;  %895 = vmax.xlane.f32.xlu0 %v894_v62  ;;  %v3083_v61 = vld [vmem:[#allocation2 + $0x8] sm:$0xff]  ;;  %v3085_v62 = vld [vmem:[#allocation2] sm:$0xff] }
 0x120   : > { %v772_v2 = vpop.f32.mrb[8].mxu1  ;;  %v619_v6 = vpop.f32.mrb[8].mxu0 }
 0x121   : > { %v3012_v4 = vsel %vm803_vm3, %v772_v2, -1e+30  ;;  %v2415_v5 = vpop.f32.mrb[9].mxu1  ;;  %v3016_v8 = vsel %vm803_vm3, %v619_v6, -1e+30  ;;  %v2385_v10 = vpop.f32.mrb[9].mxu0 }
 0x122   : > { %v775_v7 = vpop.f32.mrb[10].mxu1  ;;  %v930_v9 = vsel %vm887_vm4, %v3012_v4, -inf  ;;  %v622_v13 = vpop.f32.mrb[10].mxu0  ;;  %v900_v16 = vsel %vm887_vm4, %v3016_v8, -inf  ;;  %v3100_v6 = vld [vmem:[#allocation2 + $0x58] sm:$0xff] }
 0x123   : > { %898 = vmax.xlane.f32.xlu1 %v897_v3  ;;  %v3022_v12 = vsel %vm803_vm3, %v775_v7, -1e+30  ;;  %931 = vmax.xlane.f32.xlu0 %v930_v9  ;;  %v2416_v14 = vpop.f32.mrb[11].mxu1  ;;  %v2386_v17 = vpop.f32.mrb[11].mxu0  ;;  %v3030_v18 = vsel %vm803_vm3, %v622_v13, -1e+30 }
 0x124   : > { %v933_v15 = vsel %vm887_vm4, %v3022_v12, -inf  ;;  %v903_v19 = vsel %vm887_vm4, %v3030_v18, -inf  ;;  %v3102_v7 = vld [vmem:[#allocation2 + $0x60] sm:$0xff]  ;;  %v2563_v9 = vld [vmem:[%s3108_s25 + $0x28] sm:$0xff]  }
 0x125   : > { %v3113_v13 = vld [vmem:[#allocation2 + $0x68] sm:$0xff]  ;;  %2456 = vmatpush3.bf16.msra.mxu1 %v2563_v9 }
 0x126   : > { %2457 = vmatprep.subr.bf16.mxu1 %v3651_v0  ;;  %v2567_v9 = vld [vmem:[%s3108_s25 + $0x48] sm:$0xff]  }
 0x127   : > { %934 = vmax.xlane.f32.xlu1 %v933_v15  ;;  %901 = vmax.xlane.f32.xlu0 %v900_v16  ;;  %v3121_v16 = vld [vmem:[#allocation2 + $0x10] sm:$0xff] }
 0x128   : > { %v780_v20 = vpop.f32.mrb[12].mxu1  ;;  %v627_v21 = vpop.f32.mrb[12].mxu0 }
 0x129   : > { %v3036_v22 = vsel %vm803_vm3, %v780_v20, -1e+30  ;;  %v2419_v23 = vpop.f32.mrb[13].mxu1  ;;  %v3040_v24 = vsel %vm803_vm3, %v627_v21, -1e+30  ;;  %v2389_v26 = vpop.f32.mrb[13].mxu0 }
 0x12a   : > { %v936_v25 = vsel %vm887_vm4, %v3036_v22, -inf  ;;  %v783_v27 = vpop.f32.mrb[14].mxu1  ;;  %v630_v28 = vpop.f32.mrb[14].mxu0  ;;  %v906_v30 = vsel %vm887_vm4, %v3040_v24, -inf  ;;  %v2564_v20 = vld [vmem:[%s3108_s25 + $0x30] sm:$0xff]  }
 0x12b   : > { %904 = vmax.xlane.f32.xlu1 %v903_v19  ;;  %937 = vmax.xlane.f32.xlu0 %v936_v25  ;;  %v2420_v29 = vpop.f32.mrb[15].mxu1  ;;  %v3048_v31 = vsel %vm803_vm3, %v630_v28, -1e+30  ;;  %v2390_v32 = vpop.f32.mrb[15].mxu0  ;;  %v3052_v34 = vsel %vm803_vm3, %v783_v27, -1e+30 }
 0x12c   : > { %v909_v36 = vsel %vm887_vm4, %v3048_v31, -inf  ;;  %v939_v39 = vsel %vm887_vm4, %v3052_v34, -inf  ;;  %v3140_v27 = vld [vmem:[#allocation2 + $0x18] sm:$0xff]  ;;  %v3142_v28 = vld [vmem:[#allocation2 + $0x70] sm:$0xff]  ;;  %2458 = vmatpush3.bf16.msra.mxu1 %v2564_v20 }
 0x12d   : > { %2459 = vmatprep.subr.bf16.mxu1 %v3651_v0 }
 0x12f   : > { %907 = vmax.xlane.f32.xlu1 %v906_v30  ;;  %910 = vmax.xlane.f32.xlu0 %v909_v36  ;;  %v2565_v30 = vld [vmem:[%s3108_s25 + $0x38] sm:$0xff]  }
 0x130   : > { %v788_v37 = vpop.f32.mrb[16].mxu1  ;;  %v635_v47 = vpop.f32.mrb[16].mxu0  ;;  %2460 = vmatpush3.bf16.msra.mxu1 %v2565_v30  ;;  %v3200_v30 = vld [vmem:[#allocation2 + $0x38] sm:$0xff] }
 0x131   : > { %v3060_v40 = vsel %vm803_vm3, %v788_v37, -1e+30  ;;  %v2423_v41 = vpop.f32.mrb[17].mxu1  ;;  %v3072_v51 = vsel %vm803_vm3, %v635_v47, -1e+30  ;;  %v2393_v52 = vpop.f32.mrb[17].mxu0  ;;  %2461 = vmatprep.subr.bf16.mxu1 %v3651_v0 }
 0x132   : > { %v791_v42 = vpop.f32.mrb[18].mxu1  ;;  %v942_v43 = vsel %vm887_vm4, %v3060_v40, -inf  ;;  %v638_v53 = vpop.f32.mrb[18].mxu0  ;;  %v3159_v41 = vld [vmem:[#allocation2 + $0x78] sm:$0xff]  ;;  %v2566_v47 = vld [vmem:[%s3108_s25 + $0x40] sm:$0xff]   ;;  %3657 = vst [vmem:[#allocation8_spill] sm:$0xff] %v3200_v30 }
 0x133   : > { %940 = vmax.xlane.f32.xlu1 %v939_v39  ;;  %v3066_v45 = vsel %vm803_vm3, %v791_v42, -1e+30  ;;  %943 = vmax.xlane.f32.xlu0 %v942_v43  ;;  %v2424_v46 = vpop.f32.mrb[19].mxu1  ;;  %v3076_v54 = vsel %vm803_vm3, %v638_v53, -1e+30  ;;  %v2394_v55 = vpop.f32.mrb[19].mxu0 }
 0x134   : > { %v945_v49 = vsel %vm887_vm4, %v3066_v45, -inf  ;;  %v3161_v42 = vld [vmem:[#allocation2 + $0x20] sm:$0xff]  ;;  %2462 = vmatpush3.bf16.msra.mxu1 %v2566_v47  ;;  %v912_v43 = vsel %vm887_vm4, %v3072_v51, -inf }
 0x135   : > { %2463 = vmatprep.subr.bf16.mxu1 %v3651_v0 }
 0x137   : > { %946 = vmax.xlane.f32.xlu1 %v945_v49 }
 0x138   : > { %2464 = vmatpush3.bf16.msra.mxu1 %v2567_v9 }
 0x1a0   : > { %v920_v59 = vpop.xlane.xlu0 %919 }
 0x1a1   : > { %v3081_v60 = vmax.f32 %v3078_v57, %v920_v59  ;;  %v3180_v59 = vld [vmem:[#allocation2 + $0x28] sm:$0xff] }
 0x1a2   : > { %v893_v33 = vpop.xlane.xlu1 %892  ;;  %3655 = vst [vmem:[#allocation6_spill] sm:$0xff] %v3180_v59 }
 0x1a3   : > { %1765 = vst.msk [vmem:[#allocation2 + $0x50] sm:$0xff] %vm366_vm2, %v3081_v60  ;;  %1080 = vperm.xlu0 %2516, %v3081_v60   ;;  %v3093_v3 = vmax.f32 %v3083_v61, %v893_v33  ;;  %v3182_v33 = vld [vmem:[#allocation2 + $0x80] sm:$0xff] }
 0x1a4   : > { %v890_v2 = vpop.xlane.xlu0 %889 }
 0x1a5   : > { %v3096_v5 = vmax.f32 %v3085_v62, %v890_v2  ;;  %1756 = vst.msk [vmem:[#allocation2 + $0x8] sm:$0xff] %vm366_vm2, %v3093_v3  ;;  %v3236_v2 = vld [vmem:[#allocation2 + $0x98] sm:$0xff] }
 0x1a7   : > { %1755 = vst.msk [vmem:[#allocation2] sm:$0xff] %vm366_vm2, %v3096_v5 }
 0x1a8   : > { %v923_v10 = vpop.xlane.xlu0 %922  ;;  %v926_v11 = vpop.xlane.xlu1 %925 }
 0x1a9   : > { %v3116_v14 = vmax.f32 %v3100_v6, %v923_v10  ;;  %v3119_v15 = vmax.f32 %v3102_v7, %v926_v11 }
 0x1ab   : > { %1766 = vst.msk [vmem:[#allocation2 + $0x58] sm:$0xff] %vm366_vm2, %v3116_v14  ;;  %1767 = vst.msk [vmem:[#allocation2 + $0x60] sm:$0xff] %vm366_vm2, %v3119_v15  ;;  %1085 = vperm.xlu1 %2517, %v3116_v14  }
 0x1ac   : > { %v929_v21 = vpop.xlane.xlu1 %928  ;;  %v896_v23 = vpop.xlane.xlu0 %895 }
 0x1ad   : > { %v3135_v25 = vmax.f32 %v3113_v13, %v929_v21  ;;  %v3138_v26 = vmax.f32 %v3121_v16, %v896_v23  ;;  %v3198_v23 = vld [vmem:[#allocation2 + $0x30] sm:$0xff] }
 0x1af   : > { %1768 = vst.msk [vmem:[#allocation2 + $0x68] sm:$0xff] %vm366_vm2, %v3135_v25  ;;  %1090 = vperm.xlu1 %2517, %v3119_v15   ;;  %1757 = vst.msk [vmem:[#allocation2 + $0x10] sm:$0xff] %vm366_vm2, %v3138_v26 }
 0x1b0   : > { %v899_v32 = vpop.xlane.xlu1 %898  ;;  %v932_v36 = vpop.xlane.xlu0 %931 }
 0x1b1   : > { %v3154_v37 = vmax.f32 %v3140_v27, %v899_v32  ;;  %v3157_v39 = vmax.f32 %v3142_v28, %v932_v36  ;;  %v915_v32 = vsel %vm887_vm4, %v3076_v54, -inf }
 0x1b3   : > { %3654 = vst [vmem:[#allocation5_spill] sm:$0xff] %v3154_v37  ;;  %1095 = vperm.xlu1 %2517, %v3135_v25   ;;  %1758 = vst.msk [vmem:[#allocation2 + $0x18] sm:$0xff] %vm366_vm2, %v3154_v37 }
 0x1b4   : > { %1769 = vst.msk [vmem:[#allocation2 + $0x70] sm:$0xff] %vm366_vm2, %v3157_v39  ;;  %v935_v49 = vpop.xlane.xlu1 %934  ;;  %v902_v52 = vpop.xlane.xlu0 %901 }
 0x1b5   : > { %v3175_v53 = vmax.f32 %v3159_v41, %v935_v49  ;;  %v3178_v55 = vmax.f32 %v3161_v42, %v902_v52 }
 0x1b7   : > { %1770 = vst.msk [vmem:[#allocation2 + $0x78] sm:$0xff] %vm366_vm2, %v3175_v53  ;;  %1759 = vst.msk [vmem:[#allocation2 + $0x20] sm:$0xff] %vm366_vm2, %v3178_v55 }
 0x1b8   : > { %v905_v10 = vpop.xlane.xlu1 %904  ;;  %v938_v11 = vpop.xlane.xlu0 %937 }
 0x1b9   : > { %v3193_v20 = vmax.f32 %v3180_v59, %v905_v10  ;;  %v3196_v21 = vmax.f32 %v3182_v33, %v938_v11  ;;  %v3216_v10 = vld [vmem:[#allocation2 + $0x88] sm:$0xff]  ;;  %v3218_v11 = vld [vmem:[#allocation2 + $0x90] sm:$0xff] }
 0x1bb   : > { %3656 = vst [vmem:[#allocation7_spill] sm:$0xff] %v3193_v20  ;;  %1760 = vst.msk [vmem:[#allocation2 + $0x28] sm:$0xff] %vm366_vm2, %v3193_v20 }
 0x1bc   : > { %1771 = vst.msk [vmem:[#allocation2 + $0x80] sm:$0xff] %vm366_vm2, %v3196_v21  ;;  %v908_v47 = vpop.xlane.xlu1 %907  ;;  %v911_v49 = vpop.xlane.xlu0 %910 }
 0x1bd   : > { %v3211_v52 = vmax.f32 %v3198_v23, %v908_v47  ;;  %v3214_v9 = vmax.f32 %v3200_v30, %v911_v49  ;;  %v2572_v47 = vld [vmem:[%s3108_s25 + $0x20] sm:$0xff]  }
 0x1bf   : > { %3658 = vst [vmem:[#allocation9_spill] sm:$0xff] %v3214_v9  ;;  %1761 = vst.msk [vmem:[#allocation2 + $0x30] sm:$0xff] %vm366_vm2, %v3211_v52 }
 0x1c0   : > { %1762 = vst.msk [vmem:[#allocation2 + $0x38] sm:$0xff] %vm366_vm2, %v3214_v9  ;;  %v941_v49 = vpop.xlane.xlu1 %940  ;;  %v944_v36 = vpop.xlane.xlu0 %943 }
 0x1c1   : > { %v3231_v46 = vmax.f32 %v3216_v10, %v941_v49  ;;  %v3234_v17 = vmax.f32 %v3218_v11, %v944_v36 }
 0x1c2   : > { %916 = vmax.xlane.f32.xlu0 %v915_v32  ;;  %v2570_v32 = vld [vmem:[%s3108_s25 + $0x10] sm:$0xff]  }
 0x1c3   : > { %1772 = vst.msk [vmem:[#allocation2 + $0x88] sm:$0xff] %vm366_vm2, %v3231_v46  ;;  %1773 = vst.msk [vmem:[#allocation2 + $0x90] sm:$0xff] %vm366_vm2, %v3234_v17 }
 0x1c4   : > { %v947_v49 = vpop.xlane.xlu1 %946 }
 0x1c5   : > { %v3247_v36 = vmax.f32 %v3236_v2, %v947_v49  ;;  %v2568_v49 = vld [vmem:[%s3108_s25] sm:$0xff]  }
 0x1c6   : > { %2426 = vmatpush3.bf16.msra.mxu0 %v2568_v49  ;;  %v2571_v49 = vld [vmem:[%s3108_s25 + $0x18] sm:$0xff]  }
 0x1c7   : > { %1774 = vst.msk [vmem:[#allocation2 + $0x98] sm:$0xff] %vm366_vm2, %v3247_v36  ;;  %2427 = vmatprep.subr.bf16.mxu0 %v3651_v0 }
 0x1d7   : > { %913 = vmax.xlane.f32.xlu1 %v912_v43  ;;  %v2569_v43 = vld [vmem:[%s3108_s25 + $0x8] sm:$0xff]  }
 0x1d8   : > { %1100 = vperm.xlu0 %2516, %v3157_v39   ;;  %2428 = vmatpush3.bf16.msra.mxu0 %v2569_v43 }
 0x1d9   : > { %2429 = vmatprep.subr.bf16.mxu0 %v3651_v0 }
 0x1dc   : > { %1105 = vperm.xlu0 %2516, %v3175_v53   ;;  %2430 = vmatpush3.bf16.msra.mxu0 %v2570_v32 }
 0x1dd   : > { %2431 = vmatprep.subr.bf16.mxu0 %v3651_v0 }
 0x1e0   : > { %1110 = vperm.xlu0 %2516, %v3196_v21   ;;  %2432 = vmatpush3.bf16.msra.mxu0 %v2571_v49 }
 0x1e1   : > { %2433 = vmatprep.subr.bf16.mxu0 %v3651_v0 }
 0x1e4   : > { %1115 = vperm.xlu0 %2516, %v3231_v46   ;;  %2434 = vmatpush3.bf16.msra.mxu0 %v2572_v47 }
 0x1e8   : > { %1120 = vperm.xlu1 %2517, %v3234_v17   ;;  %1125 = vperm.xlu0 %2516, %v3247_v36  }
 0x1ec   : > { %1045 = vperm.xlu1 %2517, %v3154_v37   ;;  %1030 = vperm.xlu0 %2516, %v3096_v5  }
 0x1f0   : > { %1055 = vperm.xlu1 %2517, %v3193_v20   ;;  %1035 = vperm.xlu0 %2516, %v3093_v3  }
 0x1f4   : > { %1065 = vperm.xlu1 %2517, %v3214_v9   ;;  %1040 = vperm.xlu0 %2516, %v3138_v26  }
 0x1f8   : > { %1050 = vperm.xlu0 %2516, %v3178_v55  }
 0x1fc   : > { %1060 = vperm.xlu0 %2516, %v3211_v52  }
 0x222   : > { %v1081_v43 = vpop.permute.xlu0 %1080 }
 0x223   : > { %v1138_v29 = vsub.f32 %v2964_v35, %v1081_v43 }
 0x225   : > { %v1168_v19 = vmul.f32 1.442695, %v1138_v29 }
 0x227   : > { %2573 = vpow2.f32 %v1168_v19 }
 0x22a   : > { %v1086_v63 = vpop.permute.xlu1 %1085 }
 0x22b   : > { %v1139_v9 = vsub.f32 %v2982_v48, %v1086_v63  ;;  %v3659_v63 = vmov 0.0  }
 0x22d   : > { %v1170_v32 = vmul.f32 1.442695, %v1139_v9 }
 0x22e   : > { %v1091_v30 = vpop.permute.xlu1 %1090 }
 0x22f   : > { %2575 = vpow2.f32 %v1170_v32  ;;  %v1140_v20 = vsub.f32 %v2986_v50, %v1091_v30  ;;  %v3662_v30 = vsub.f32 %v3113_v13, %v3135_v25 }
 0x231   : > { %v1172_v49 = vmul.f32 1.442695, %v1140_v20  ;;  %v3282_v47 = vpop.eup %2573  ;;  %v3306_v20 = vld [vmem:[#allocation2 + $0x48] sm:$0xff]  ;;  %v1014_v9 = vmul.f32 1.442695, %v3662_v30 }
 0x232   : > { %v1096_v59 = vpop.permute.xlu1 %1095 }
 0x233   : > { %v1141_v0 = vsub.f32 %v2998_v58, %v1096_v59  ;;  %2577 = vpow2.f32 %v1172_v49  ;;  %v3660_v58 = vsub.f32 %v3078_v57, %v3081_v60  ;;  %v3663_v60 = vsub.f32 %v3159_v41, %v3175_v53 }
 0x235   : > { %v1174_v37 = vmul.f32 1.442695, %v1141_v0  ;;  %v1008_v29 = vmul.f32 1.442695, %v3660_v58 }
 0x237   : > { %2579 = vpow2.f32 %v1174_v37  ;;  %v3661_v37 = vsub.f32 %v3102_v7, %v3119_v15  ;;  %v1018_v7 = vmul.f32 1.442695, %v3663_v60 }
 0x238   : > { %2581 = vpow2.f32 %v1008_v29 }
 0x239   : > { %v3284_v35 = vpop.eup %2575  ;;  %v1012_v59 = vmul.f32 1.442695, %v3661_v37 }
 0x23a   : > { %v1474_v48 = vpack.c.bf16 %v3284_v35, %v3282_v47 }
 0x23b   : > { %2583 = vpow2.f32 %v1012_v59  ;;  %v3665_v59 = vsub.f32 %v3142_v28, %v3157_v39 }
 0x23c   : > { %2466 = vmatmul.mubr.msk.bf16.vlgmr.msra.gmra.mrb[20].mxu1 %vm887_vm4, %v1474_v48  ;;  %2585 = vpow2.f32 %v1014_v9  ;;  %v3664_v48 = vsub.f32 %v3100_v6, %v3116_v14 }
 0x23d   : > { %2469 = vmatprep.mubr.msk.bf16.mxu1 %vm2718_vm1, %v3659_v63  ;;  %v3291_v50 = vpop.eup %2577  ;;  %2587 = vpow2.f32 %v1018_v7  ;;  %v1016_v30 = vmul.f32 1.442695, %v3665_v59 }
 0x241   : > { %v3293_v19 = vpop.eup %2579 }
 0x242   : > { %v1475_v0 = vpack.c.bf16 %v3293_v19, %v3291_v50  ;;  %v3322_v15 = vpop.eup %2581 }
 0x244   : > { %2470 = vmatmul.mubr.msk.bf16.gmra.mrb[24].mxu1 %vm887_vm4, %v1475_v0  ;;  %v1010_v0 = vmul.f32 1.442695, %v3664_v48 }
 0x245   : > { %2473 = vmatprep.mubr.msk.bf16.mxu1 %vm2718_vm1, %v3659_v63  ;;  %v3326_v49 = vpop.eup %2583 }
 0x246   : > { %v3333_v53 = vpop.eup %2585  ;;  %2589 = vpow2.f32 %v1010_v0 }
 0x247   : > { %v3340_v14 = vpop.eup %2587 }
 0x24f   : > { %v917_v43 = vpop.xlane.xlu0 %916 }
 0x250   : > { %v3312_v32 = vmax.f32 %v3306_v20, %v917_v43  ;;  %v3346_v43 = vld [vmem:[#allocation2 + $0x40] sm:$0xff] }
 0x252   : > { %v977_v57 = vsub.f32 %v3306_v20, %v3312_v32  ;;  %1764 = vst.msk [vmem:[#allocation2 + $0x48] sm:$0xff] %vm366_vm2, %v3312_v32  ;;  %1075 = vperm.xlu1 %2517, %v3312_v32  }
 0x256   : > { %1401 = vperm.xlu1 %2517, %v3322_v15  }
 0x257   : > { %v1101_v13 = vpop.permute.xlu0 %1100 }
 0x258   : > { %v1142_v25 = vsub.f32 %v3012_v4, %v1101_v13 }
 0x25a   : > { %1411 = vperm.xlu1 %2517, %v3326_v49   ;;  %v1176_v58 = vmul.f32 1.442695, %v1142_v25  ;;  %v3357_v25 = vpop.eup %2589 }
 0x25b   : > { %v1106_v29 = vpop.permute.xlu0 %1105 }
 0x25c   : > { %v1143_v41 = vsub.f32 %v3022_v12, %v1106_v29  ;;  %2591 = vpow2.f32 %v1176_v58  ;;  %v3666_v12 = vsub.f32 %v3182_v33, %v3196_v21 }
 0x25e   : > { %v1178_v37 = vmul.f32 1.442695, %v1143_v41  ;;  %1416 = vperm.xlu1 %2517, %v3333_v53   ;;  %v1020_v9 = vmul.f32 1.442695, %v3666_v12 }
 0x25f   : > { %v1111_v4 = vpop.permute.xlu0 %1110 }
 0x260   : > { %2593 = vpow2.f32 %v1178_v37  ;;  %v1144_v6 = vsub.f32 %v3036_v22, %v1111_v4 }
 0x261   : > { %2595 = vpow2.f32 %v1016_v30 }
 0x262   : > { %1426 = vperm.xlu1 %2517, %v3340_v14   ;;  %v1180_v60 = vmul.f32 1.442695, %v1144_v6  ;;  %2597 = vpow2.f32 %v1020_v9 }
 0x263   : > { %v1116_v7 = vpop.permute.xlu0 %1115 }
 0x264   : > { %v1145_v13 = vsub.f32 %v3052_v34, %v1116_v7  ;;  %v914_v28 = vpop.xlane.xlu1 %913  ;;  %2599 = vpow2.f32 %v1180_v60 }
 0x265   : > { %v3350_v39 = vmax.f32 %v3346_v43, %v914_v28 }
 0x266   : > { %v1182_v22 = vmul.f32 1.442695, %v1145_v13  ;;  %v3360_v0 = vpop.eup %2591 }
 0x267   : > { %v976_v33 = vsub.f32 %v3346_v43, %v3350_v39  ;;  %1763 = vst.msk [vmem:[#allocation2 + $0x40] sm:$0xff] %vm366_vm2, %v3350_v39  ;;  %1070 = vperm.xlu0 %2516, %v3350_v39   ;;  %v1126_v21 = vpop.permute.xlu0 %1125 }
 0x268   : > { %2601 = vpow2.f32 %v1182_v22  ;;  %v1147_v34 = vsub.f32 %v3066_v45, %v1126_v21  ;;  %v1121_v48 = vpop.permute.xlu1 %1120 }
 0x269   : > { %v1146_v58 = vsub.f32 %v3060_v40, %v1121_v48 }
 0x26a   : > { %v3363_v29 = vpop.eup %2593  ;;  %v1186_v41 = vmul.f32 1.442695, %v1147_v34 }
 0x26b   : > { %v1184_v37 = vmul.f32 1.442695, %v1146_v58  ;;  %1406 = vperm.xlu0 %2516, %v3357_v25   ;;  %v1031_v4 = vpop.permute.xlu0 %1030  ;;  %v1476_v59 = vpack.c.bf16 %v3363_v29, %v3360_v0  ;;  %v3370_v45 = vpop.eup %2595 }
 0x26c   : > { %v1128_v30 = vsub.f32 %v2968_v38, %v1031_v4  ;;  %2603 = vpow2.f32 %v1186_v41  ;;  %v3375_v12 = vpop.eup %2597  ;;  %v1046_v38 = vpop.permute.xlu1 %1045 }
 0x26d   : > { %2474 = vmatmul.mubr.msk.bf16.gmra.mrb[28].mxu1 %vm887_vm4, %v1476_v59  ;;  %2605 = vpow2.f32 %v1184_v37  ;;  %v1131_v21 = vsub.f32 %v3006_v1, %v1046_v38 }
 0x26e   : > { %2477 = vmatprep.mubr.msk.bf16.mxu1 %vm2718_vm1, %v3659_v63  ;;  %v1148_v40 = vmul.f32 1.442695, %v1128_v30  ;;  %v3378_v60 = vpop.eup %2599 }
 0x26f   : > { %1421 = vperm.xlu0 %2516, %v3370_v45   ;;  %v1036_v6 = vpop.permute.xlu0 %1035  ;;  %v1154_v37 = vmul.f32 1.442695, %v1131_v21 }
 0x270   : > { %v1129_v9 = vsub.f32 %v2974_v44, %v1036_v6  ;;  %2607 = vpow2.f32 %v1148_v40  ;;  %v1056_v4 = vpop.permute.xlu1 %1055 }
 0x272   : > { %v3380_v7 = vpop.eup %2601  ;;  %v1150_v13 = vmul.f32 1.442695, %v1129_v9 }
 0x273   : > { %1431 = vperm.xlu0 %2516, %v3375_v12   ;;  %v1041_v28 = vpop.permute.xlu0 %1040  ;;  %v1477_v22 = vpack.c.bf16 %v3380_v7, %v3378_v60 }
 0x274   : > { %2609 = vpow2.f32 %v1150_v13  ;;  %v1130_v34 = vsub.f32 %v2994_v56, %v1041_v28  ;;  %v1133_v56 = vsub.f32 %v3030_v18, %v1056_v4  ;;  %v1066_v28 = vpop.permute.xlu1 %1065  ;;  %v1261_v4 = vsel %vm887_vm4, %v3284_v35, 0.0 }
 0x275   : > { %2478 = vmatmul.mubr.msk.bf16.gmra.mrb[32].mxu1 %vm887_vm4, %v1477_v22  ;;  %v1135_v18 = vsub.f32 %v3048_v31, %v1066_v28  ;;  %v1270_v35 = vsel %vm887_vm4, %v3360_v0, 0.0  ;;  %v1276_v0 = vsel %vm887_vm4, %v3378_v60, 0.0  ;;  %v3667_v60 = vsub.f32 %v3216_v10, %v3231_v46 }
 0x276   : > { %v1152_v44 = vmul.f32 1.442695, %v1130_v34  ;;  %2481 = vmatprep.mubr.msk.bf16.mxu1 %vm2718_vm1, %v3659_v63  ;;  %v3390_v48 = vpop.eup %2603  ;;  %v1158_v13 = vmul.f32 1.442695, %v1133_v56  ;;  %v1258_v56 = vsel %vm887_vm4, %v3282_v47, 0.0  ;;  %v1264_v47 = vsel %vm887_vm4, %v3291_v50, 0.0 }
 0x277   : > { %v1051_v58 = vpop.permute.xlu0 %1050  ;;  %v3392_v41 = vpop.eup %2605  ;;  %v1285_v46 = vsel %vm887_vm4, %v3390_v48, 0.0  ;;  %v3668_v10 = vsub.f32 %v3218_v11, %v3234_v17 }
 0x278   : > { %2611 = vpow2.f32 %v1152_v44  ;;  %v1132_v59 = vsub.f32 %v3016_v8, %v1051_v58  ;;  %v1478_v1 = vpack.c.bf16 %v3390_v48, %v3392_v41  ;;  %v1282_v50 = vsel %vm887_vm4, %v3392_v41, 0.0 }
 0x279   : > { %2613 = vpow2.f32 %v1154_v37  ;;  %v1162_v37 = vmul.f32 1.442695, %v1135_v18  ;;  %v1279_v18 = vsel %vm887_vm4, %v3380_v7, 0.0 }
 0x27a   : > { %v2608_v30 = vpop.eup %2607  ;;  %v1156_v6 = vmul.f32 1.442695, %v1132_v59 }
 0x27b   : > { %v1061_v38 = vpop.permute.xlu0 %1060  ;;  %v1228_v21 = vsel %vm887_vm4, %v2608_v30, 0.0 }
 0x27c   : > { %2615 = vpow2.f32 %v1156_v6  ;;  %v1134_v8 = vsub.f32 %v3040_v24, %v1061_v38 }
 0x27d   : > { %2482 = vmatmul.mubr.msk.bf16.gmra.mrb[36].mxu1 %vm887_vm4, %v1478_v1  ;;  %2617 = vpow2.f32 %v1158_v13 }
 0x27e   : > { %v2610_v40 = vpop.eup %2609  ;;  %v1160_v44 = vmul.f32 1.442695, %v1134_v8 }
 0x27f   : > { %v1469_v9 = vpack.c.bf16 %v2610_v40, %v2608_v30  ;;  %v1231_v6 = vsel %vm887_vm4, %v2610_v40, 0.0  ;;  %v1267_v40 = vsel %vm887_vm4, %v3293_v19, 0.0 }
 0x280   : > { %2619 = vpow2.f32 %v1160_v44 }
 0x281   : > { %2436 = vmatmul.mubr.msk.bf16.vlgmr.msra.gmra.mrb[20].mxu0 %vm887_vm4, %v1469_v9  ;;  %2621 = vpow2.f32 %v1162_v37 }
 0x282   : > { %2439 = vmatprep.mubr.msk.bf16.mxu0 %vm2718_vm1, %v3659_v63  ;;  %v2612_v22 = vpop.eup %2611 }
 0x283   : > { %v2614_v34 = vpop.eup %2613  ;;  %v1234_v31 = vsel %vm887_vm4, %v2612_v22, 0.0 }
 0x284   : > { %v1470_v58 = vpack.c.bf16 %v2614_v34, %v2612_v22  ;;  %v1237_v8 = vsel %vm887_vm4, %v2614_v34, 0.0  ;;  %v1022_v22 = vmul.f32 1.442695, %v3667_v60 }
 0x286   : > { %1229 = vadd.xlane.f32.xlu1 %v1228_v21  ;;  %v2616_v24 = vpop.eup %2615  ;;  %2623 = vpow2.f32 %v1022_v22 }
 0x287   : > { %v2618_v59 = vpop.eup %2617  ;;  %v1240_v9 = vsel %vm887_vm4, %v2616_v24, 0.0 }
 0x288   : > { %v1471_v1 = vpack.c.bf16 %v2618_v59, %v2616_v24  ;;  %v1243_v19 = vsel %vm887_vm4, %v2618_v59, 0.0 }
 0x289   : > { %2440 = vmatmul.mubr.msk.bf16.gmra.mrb[24].mxu0 %vm887_vm4, %v1470_v58 }
 0x28a   : > { %1262 = vadd.xlane.f32.xlu1 %v1261_v4  ;;  %2443 = vmatprep.mubr.msk.bf16.mxu0 %vm2718_vm1, %v3659_v63  ;;  %v2620_v30 = vpop.eup %2619 }
 0x28b   : > { %v2622_v38 = vpop.eup %2621  ;;  %v1246_v28 = vsel %vm887_vm4, %v2620_v30, 0.0 }
 0x28c   : > { %v1472_v13 = vpack.c.bf16 %v2622_v38, %v2620_v30  ;;  %v1249_v41 = vsel %vm887_vm4, %v2622_v38, 0.0 }
 0x28e   : > { %1235 = vadd.xlane.f32.xlu1 %v1234_v31 }
 0x290   : > { %v3442_v21 = vpop.eup %2623 }
 0x291   : > { %2444 = vmatmul.mubr.msk.bf16.gmra.mrb[28].mxu0 %vm887_vm4, %v1471_v1 }
 0x292   : > { %1259 = vadd.xlane.f32.xlu0 %v1258_v56  ;;  %1271 = vadd.xlane.f32.xlu1 %v1270_v35  ;;  %v968_v56 = vsub.f32 %v3085_v62, %v3096_v5  ;;  %v972_v62 = vsub.f32 %v3161_v42, %v3178_v55  ;;  %v1340_v5 = vld [vmem:[#allocation4 + $0x58] sm:$0xff]  ;;  %v1341_v55 = vld [vmem:[#allocation4 + $0x60] sm:$0xff] }
 0x293   : > { %2447 = vmatprep.mubr.msk.bf16.mxu0 %vm2718_vm1, %v3659_v63 }
 0x294   : > { %v988_v35 = vmul.f32 1.442695, %v968_v56 }
 0x296   : > { %1232 = vadd.xlane.f32.xlu0 %v1231_v6  ;;  %1241 = vadd.xlane.f32.xlu1 %v1240_v9  ;;  %v970_v6 = vsub.f32 %v3121_v16, %v3138_v26 }
 0x298   : > { %v992_v38 = vmul.f32 1.442695, %v970_v6  ;;  %v1202_v6 = vld [vmem:[#allocation3 + $0x70] sm:$0xff] }
 0x299   : > { %2448 = vmatmul.mubr.msk.bf16.gmra.mrb[32].mxu0 %vm887_vm4, %v1472_v13 }
 0x29a   : > { %1265 = vadd.xlane.f32.xlu0 %v1264_v47  ;;  %1277 = vadd.xlane.f32.xlu1 %v1276_v0  ;;  %v1339_v47 = vld [vmem:[#allocation4 + $0x50] sm:$0xff] }
 0x29b   : > { %2451 = vmatprep.mubr.msk.bf16.mxu0 %vm2718_vm1, %v3659_v63  ;;  %v1273_v63 = vsel %vm887_vm4, %v3363_v29, 0.0  ;;  %v1024_v29 = vmul.f32 1.442695, %v3668_v10  ;;  %v1342_v10 = vld [vmem:[#allocation4 + $0x68] sm:$0xff] }
 0x29d   : > { %2625 = vpow2.f32 %v1024_v29 }
 0x29e   : > { %1268 = vadd.xlane.f32.xlu0 %v1267_v40  ;;  %1247 = vadd.xlane.f32.xlu1 %v1246_v28  ;;  %v1188_v28 = vld [vmem:[#allocation3] sm:$0xff] }
 0x2a2   : > { %1238 = vadd.xlane.f32.xlu0 %v1237_v8  ;;  %1283 = vadd.xlane.f32.xlu1 %v1282_v50 }
 0x2a6   : > { %1274 = vadd.xlane.f32.xlu0 %v1273_v63  ;;  %v996_v63 = vmul.f32 1.442695, %v972_v62  ;;  %v1222_v62 = vmul.f32 %v3370_v45, %v1202_v6 }
 0x2a7   : > { %v3450_v34 = vpop.eup %2625 }
 0x2aa   : > { %1244 = vadd.xlane.f32.xlu0 %v1243_v19 }
 0x2ae   : > { %1280 = vadd.xlane.f32.xlu0 %v1279_v18 }
 0x2b2   : > { %1250 = vadd.xlane.f32.xlu0 %v1249_v41  ;;  %v1199_v41 = vld [vmem:[#allocation3 + $0x58] sm:$0xff] }
 0x2b3   : > { %1436 = vperm.xlu1 %2517, %v3442_v21  }
 0x2b6   : > { %1286 = vadd.xlane.f32.xlu0 %v1285_v46 }
 0x2cc   : > { %1441 = vperm.xlu0 %2516, %v3450_v34  }
 0x2d1   : > { %v1076_v7 = vpop.permute.xlu1 %1075 }
 0x2d2   : > { %v1137_v44 = vsub.f32 %v3076_v54, %v1076_v7  ;;  %v3669_v54 = vsub.f32 %v3236_v2, %v3247_v36  ;;  %v969_v2 = vsub.f32 %v3083_v61, %v3093_v3 }
 0x2d4   : > { %v1166_v58 = vmul.f32 1.442695, %v1137_v44  ;;  %v1026_v1 = vmul.f32 1.442695, %v3669_v54  ;;  %v990_v8 = vmul.f32 1.442695, %v969_v2  ;;  %v1219_v44 = vmul.f32 %v3357_v25, %v1199_v41 }
 0x2d6   : > { %2627 = vpow2.f32 %v1166_v58 }
 0x2e0   : > { %v2628_v4 = vpop.eup %2627 }
 0x2e1   : > { %v1255_v31 = vsel %vm887_vm4, %v2628_v4, 0.0 }
 0x2e6   : > { %v1071_v37 = vpop.permute.xlu0 %1070 }
 0x2e7   : > { %v1136_v24 = vsub.f32 %v3072_v51, %v1071_v37  ;;  %v1402_v51 = vpop.permute.xlu1 %1401 }
 0x2e8   : > { %v1459_v0 = vmul.f32 %v1402_v51, %v1339_v47 }
 0x2e9   : > { %v1164_v48 = vmul.f32 1.442695, %v1136_v24  ;;  %v1190_v24 = vld [vmem:[#allocation3 + $0x10] sm:$0xff] }
 0x2ea   : > { %v1407_v36 = vpop.permute.xlu0 %1406 }
 0x2eb   : > { %2629 = vpow2.f32 %v1164_v48  ;;  %1256 = vadd.xlane.f32.xlu0 %v1255_v31  ;;  %v1412_v30 = vpop.permute.xlu1 %1411  ;;  %v1460_v50 = vmul.f32 %v1407_v36, %v1340_v5 }
 0x2ec   : > { %2631 = vpow2.f32 %v1026_v1  ;;  %v1461_v7 = vmul.f32 %v1412_v30, %v1341_v55  ;;  %v3673_v55 = vld [vmem:[#allocation6_spill] sm:$0xff] }
 0x2ed   : > { %2633 = vpow2.f32 %v988_v35 }
 0x2ee   : > { %2635 = vpow2.f32 %v992_v38  ;;  %v3479_v29 = vpop.permute.xlu0 %1421  ;;  %v1198_v38 = vld [vmem:[#allocation3 + $0x50] sm:$0xff] }
 0x2ef   : > { %v1417_v13 = vpop.permute.xlu1 %1416  ;;  %2637 = vpow2.f32 %v990_v8  ;;  %v1218_v5 = vmul.f32 %v3322_v15, %v1198_v38  ;;  %v1189_v8 = vld [vmem:[#allocation3 + $0x8] sm:$0xff]  ;;  %v3676_v38 = vld [vmem:[#allocation8_spill] sm:$0xff] }
 0x2f0   : > { %2639 = vpow2.f32 %v996_v63  ;;  %v1462_v48 = vmul.f32 %v1417_v13, %v1342_v10 }
 0x2f2   : > { %v3491_v35 = vpop.permute.xlu0 %1431 }
 0x2f3   : > { %v3474_v16 = vpop.permute.xlu1 %1426 }
 0x2f5   : > { %v2630_v17 = vpop.eup %2629 }
 0x2f6   : > { %v1252_v11 = vsel %vm887_vm4, %v2630_v17, 0.0  ;;  %v1473_v59 = vpack.c.bf16 %v2628_v4, %v2630_v17  ;;  %v3465_v9 = vpop.eup %2631 }
 0x2f7   : > { %1253 = vadd.xlane.f32.xlu1 %v1252_v11  ;;  %v3472_v40 = vpop.eup %2633 }
 0x2f8   : > { %2452 = vmatmul.mubr.msk.bf16.gmra.mrb[36].mxu0 %vm887_vm4, %v1473_v59  ;;  %v1208_v42 = vmul.f32 %v3472_v40, %v1188_v28  ;;  %v3483_v58 = vpop.eup %2635  ;;  %v3670_v59 = vsub.f32 %v3198_v23, %v3211_v52  ;;  %v3671_v23 = vld [vmem:[#allocation5_spill] sm:$0xff] }
 0x2f9   : > { %v1210_v51 = vmul.f32 %v3483_v58, %v1190_v24  ;;  %v3672_v52 = vsub.f32 %v3140_v27, %v3671_v23  ;;  %v3497_v2 = vpop.eup %2637  ;;  %v1192_v28 = vld [vmem:[#allocation3 + $0x20] sm:$0xff]  ;;  %v1194_v24 = vld [vmem:[#allocation3 + $0x30] sm:$0xff] }
 0x2fa   : > { %v1000_v54 = vmul.f32 1.442695, %v3670_v59  ;;  %v3502_v36 = vpop.eup %2639  ;;  %v1209_v45 = vmul.f32 %v3497_v2, %v1189_v8 }
 0x2fb   : > { %v994_v47 = vmul.f32 1.442695, %v3672_v52 }
 0x2fc   : > { %2641 = vpow2.f32 %v1000_v54 }
 0x2fd   : > { %2643 = vpow2.f32 %v994_v47 }
 0x308   : > { %1446 = vperm.xlu1 %2517, %v3465_v9  }
 0x30f   : > { %v1676_v26 = vpop.f32.mrb[20].mxu1 }
 0x310   : > { %v1725_v60 = vadd.f32 %v1676_v26, %v1459_v0  ;;  %v2467_v22 = vpop.f32.mrb[21].mxu1 }
 0x311   : > { %v1679_v19 = vpop.f32.mrb[22].mxu1  ;;  %v1212_v22 = vmul.f32 %v3502_v36, %v1192_v28 }
 0x312   : > { %1745 = vst.msk [vmem:[#allocation4 + $0x50] sm:$0xff] %vm407_vm0, %v1725_v60  ;;  %v1726_v61 = vadd.f32 %v1679_v19, %v1460_v50  ;;  %v2468_v3 = vpop.f32.mrb[23].mxu1  ;;  %v1204_v19 = vld [vmem:[#allocation3 + $0x80] sm:$0xff] }
 0x313   : > { %v1230_v18 = vpop.xlane.xlu1 %1229  ;;  %v1224_v10 = vmul.f32 %v3375_v12, %v1204_v19 }
 0x314   : > { %1746 = vst.msk [vmem:[#allocation4 + $0x58] sm:$0xff] %vm407_vm0, %v1726_v61  ;;  %v1288_v46 = vadd.f32 %v1230_v18, %v1208_v42  ;;  %v1200_v61 = vld [vmem:[#allocation3 + $0x60] sm:$0xff]  ;;  %v3674_v18 = vld [vmem:[#allocation7_spill] sm:$0xff] }
 0x315   : > { %v3675_v41 = vsub.f32 %v3673_v55, %v3674_v18 }
 0x316   : > { %1309 = vst.msk [vmem:[#allocation3] sm:$0xff] %vm366_vm2, %v1288_v46 }
 0x317   : > { %v1684_v37 = vpop.f32.mrb[24].mxu1  ;;  %v1263_v4 = vpop.xlane.xlu1 %1262  ;;  %v998_v46 = vmul.f32 1.442695, %v3675_v41 }
 0x318   : > { %v1727_v31 = vadd.f32 %v1684_v37, %v1461_v7  ;;  %v1299_v17 = vadd.f32 %v1263_v4, %v1219_v44  ;;  %v2471_v11 = vpop.f32.mrb[25].mxu1  ;;  %v1220_v7 = vmul.f32 %v3326_v49, %v1200_v61  ;;  %v3515_v44 = vpop.eup %2641 }
 0x319   : > { %v1687_v1 = vpop.f32.mrb[26].mxu1  ;;  %v1214_v59 = vmul.f32 %v3515_v44, %v1194_v24  ;;  %v3521_v49 = vpop.eup %2643 }
 0x31a   : > { %1747 = vst.msk [vmem:[#allocation4 + $0x60] sm:$0xff] %vm407_vm0, %v1727_v31  ;;  %v1728_v56 = vadd.f32 %v1687_v1, %v1462_v48  ;;  %v2472_v25 = vpop.f32.mrb[27].mxu1  ;;  %v1201_v48 = vld [vmem:[#allocation3 + $0x68] sm:$0xff] }
 0x31b   : > { %1320 = vst.msk [vmem:[#allocation3 + $0x58] sm:$0xff] %vm366_vm2, %v1299_v17  ;;  %v1236_v30 = vpop.xlane.xlu1 %1235  ;;  %v1221_v12 = vmul.f32 %v3333_v53, %v1201_v48  ;;  %v1191_v25 = vld [vmem:[#allocation3 + $0x18] sm:$0xff] }
 0x31c   : > { %1748 = vst.msk [vmem:[#allocation4 + $0x68] sm:$0xff] %vm407_vm0, %v1728_v56  ;;  %v1290_v13 = vadd.f32 %v1236_v30, %v1210_v51  ;;  %v1206_v56 = vld [vmem:[#allocation3 + $0x90] sm:$0xff]  ;;  %v1211_v47 = vmul.f32 %v3521_v49, %v1191_v25  ;;  %v1344_v48 = vld [vmem:[#allocation4 + $0x78] sm:$0xff] }
 0x31d   : > { %v1226_v53 = vmul.f32 %v3450_v34, %v1206_v56  ;;  %v1193_v34 = vld [vmem:[#allocation3 + $0x28] sm:$0xff]  ;;  %v1464_v56 = vmul.f32 %v3474_v16, %v1344_v48 }
 0x31e   : > { %1311 = vst.msk [vmem:[#allocation3 + $0x10] sm:$0xff] %vm366_vm2, %v1290_v13  ;;  %v3677_v13 = vld [vmem:[#allocation9_spill] sm:$0xff] }
 0x31f   : > { %v1272_v0 = vpop.xlane.xlu1 %1271  ;;  %v1260_v26 = vpop.xlane.xlu0 %1259  ;;  %v3678_v23 = vsub.f32 %v3676_v38, %v3677_v13 }
 0x320   : > { %v1302_v50 = vadd.f32 %v1272_v0, %v1222_v62  ;;  %v1298_v60 = vadd.f32 %v1260_v26, %v1218_v5  ;;  %v1203_v0 = vld [vmem:[#allocation3 + $0x78] sm:$0xff] }
 0x321   : > { %v1002_v52 = vmul.f32 1.442695, %v3678_v23 }
 0x322   : > { %v1789_v27 = vld [vmem:[#allocation3 + $0x58] sm:$0xff]  ;;  %1323 = vst.msk [vmem:[#allocation3 + $0x70] sm:$0xff] %vm366_vm2, %v1302_v50  ;;  %1319 = vst.msk [vmem:[#allocation3 + $0x50] sm:$0xff] %vm366_vm2, %v1298_v60  ;;  %v1223_v50 = vmul.f32 %v3340_v14, %v1203_v0 }
 0x323   : > { %2645 = vrcp.f32 %v1789_v27  ;;  %v1242_v15 = vpop.xlane.xlu1 %1241  ;;  %v1233_v63 = vpop.xlane.xlu0 %1232 }
 0x324   : > { %v1292_v3 = vadd.f32 %v1242_v15, %v1212_v22  ;;  %v1289_v42 = vadd.f32 %v1233_v63, %v1209_v45  ;;  %2647 = vpow2.f32 %v998_v46 }
 0x326   : > { %1313 = vst.msk [vmem:[#allocation3 + $0x20] sm:$0xff] %vm366_vm2, %v1292_v3  ;;  %1310 = vst.msk [vmem:[#allocation3 + $0x8] sm:$0xff] %vm366_vm2, %v1289_v42  ;;  %v1205_v3 = vld [vmem:[#allocation3 + $0x88] sm:$0xff] }
 0x327   : > { %v1278_v37 = vpop.xlane.xlu1 %1277  ;;  %v1266_v4 = vpop.xlane.xlu0 %1265  ;;  %v1225_v55 = vmul.f32 %v3442_v21, %v1205_v3 }
 0x328   : > { %v1304_v31 = vadd.f32 %v1278_v37, %v1224_v10  ;;  %v1300_v17 = vadd.f32 %v1266_v4, %v1220_v7  ;;  %v1195_v10 = vld [vmem:[#allocation3 + $0x38] sm:$0xff]  ;;  %v1343_v37 = vld [vmem:[#allocation4 + $0x70] sm:$0xff] }
 0x329   : > { %v1788_v11 = vld [vmem:[#allocation3 + $0x50] sm:$0xff]  ;;  %v1463_v21 = vmul.f32 %v3479_v29, %v1343_v37 }
 0x32a   : > { %1325 = vst.msk [vmem:[#allocation3 + $0x80] sm:$0xff] %vm366_vm2, %v1304_v31  ;;  %1321 = vst.msk [vmem:[#allocation3 + $0x60] sm:$0xff] %vm366_vm2, %v1300_v17  ;;  %2649 = vrcp.f32 %v1788_v11  ;;  %v1792_v22 = vld [vmem:[#allocation3 + $0x70] sm:$0xff]  ;;  %v1207_v11 = vld [vmem:[#allocation3 + $0x98] sm:$0xff] }
 0x32b   : > { %v1248_v54 = vpop.xlane.xlu1 %1247  ;;  %v1269_v1 = vpop.xlane.xlu0 %1268  ;;  %2651 = vpow2.f32 %v1002_v52  ;;  %v1345_v52 = vld [vmem:[#allocation4 + $0x80] sm:$0xff] }
 0x32c   : > { %v1294_v30 = vadd.f32 %v1248_v54, %v1214_v59  ;;  %v1301_v6 = vadd.f32 %v1269_v1, %v1221_v12 }
 0x32d   : > { %v2646_v51 = vpop.eup %2645 }
 0x32e   : > { %1895 = vperm.xlu1 %2517, %v2646_v51   ;;  %1315 = vst.msk [vmem:[#allocation3 + $0x30] sm:$0xff] %vm366_vm2, %v1294_v30  ;;  %1322 = vst.msk [vmem:[#allocation3 + $0x68] sm:$0xff] %vm366_vm2, %v1301_v6  ;;  %v3533_v60 = vpop.eup %2647  ;;  %v1227_v6 = vmul.f32 %v3465_v9, %v1207_v11  ;;  %v1465_v9 = vmul.f32 %v3491_v35, %v1345_v52  ;;  %v1004_v35 = vmul.f32 1.442695, %v976_v33 }
 0x32f   : > { %v1284_v62 = vpop.xlane.xlu1 %1283  ;;  %v1239_v5 = vpop.xlane.xlu0 %1238  ;;  %v1213_v19 = vmul.f32 %v3533_v60, %v1193_v34 }
 0x330   : > { %v1306_v26 = vadd.f32 %v1284_v62, %v1226_v53  ;;  %v1291_v28 = vadd.f32 %v1239_v5, %v1211_v47  ;;  %v1346_v47 = vld [vmem:[#allocation4 + $0x88] sm:$0xff] }
 0x331   : > { %v1790_v8 = vld [vmem:[#allocation3 + $0x60] sm:$0xff] }
 0x332   : > { %1327 = vst.msk [vmem:[#allocation3 + $0x90] sm:$0xff] %vm366_vm2, %v1306_v26  ;;  %1312 = vst.msk [vmem:[#allocation3 + $0x18] sm:$0xff] %vm366_vm2, %v1291_v28  ;;  %2653 = vrcp.f32 %v1790_v8  ;;  %v1794_v42 = vld [vmem:[#allocation3 + $0x80] sm:$0xff] }
 0x333   : > { %v1275_v27 = vpop.xlane.xlu0 %1274  ;;  %2655 = vrcp.f32 %v1792_v22  ;;  %v1437_v62 = vpop.permute.xlu1 %1436 }
 0x334   : > { %v2650_v45 = vpop.eup %2649  ;;  %v1303_v15 = vadd.f32 %v1275_v27, %v1223_v50  ;;  %v1466_v28 = vmul.f32 %v1437_v62, %v1346_v47 }
 0x335   : > { %1890 = vperm.xlu0 %2516, %v2650_v45   ;;  %v1791_v63 = vld [vmem:[#allocation3 + $0x68] sm:$0xff]  ;;  %v3539_v41 = vpop.eup %2651  ;;  %v1347_v45 = vld [vmem:[#allocation4 + $0x90] sm:$0xff] }
 0x336   : > { %1324 = vst.msk [vmem:[#allocation3 + $0x78] sm:$0xff] %vm366_vm2, %v1303_v15  ;;  %2657 = vrcp.f32 %v1791_v63  ;;  %v1215_v31 = vmul.f32 %v3539_v41, %v1195_v10  ;;  %v1780_v10 = vld [vmem:[#allocation3 + $0x10] sm:$0xff] }
 0x337   : > { %v1245_v61 = vpop.xlane.xlu0 %1244  ;;  %2659 = vrcp.f32 %v1794_v42 }
 0x338   : > { %v1293_v14 = vadd.f32 %v1245_v61, %v1213_v19 }
 0x339   : > { %v1796_v18 = vld [vmem:[#allocation3 + $0x90] sm:$0xff] }
 0x33a   : > { %1314 = vst.msk [vmem:[#allocation3 + $0x28] sm:$0xff] %vm366_vm2, %v1293_v14  ;;  %2661 = vrcp.f32 %v1796_v18  ;;  %v1778_v18 = vld [vmem:[#allocation3] sm:$0xff] }
 0x33b   : > { %v1281_v46 = vpop.xlane.xlu0 %1280 }
 0x33c   : > { %v2654_v7 = vpop.eup %2653  ;;  %v1305_v4 = vadd.f32 %v1281_v46, %v1225_v55 }
 0x33d   : > { %1900 = vperm.xlu0 %2516, %v2654_v7   ;;  %v1793_v24 = vld [vmem:[#allocation3 + $0x78] sm:$0xff]  ;;  %v2656_v59 = vpop.eup %2655 }
 0x33e   : > { %1326 = vst.msk [vmem:[#allocation3 + $0x88] sm:$0xff] %vm366_vm2, %v1305_v4  ;;  %2663 = vrcp.f32 %v1793_v24  ;;  %v1006_v24 = vmul.f32 1.442695, %v977_v57 }
 0x33f   : > { %v1251_v17 = vpop.xlane.xlu0 %1250 }
 0x340   : > { %v1295_v12 = vadd.f32 %v1251_v17, %v1215_v31  ;;  %v1692_v54 = vpop.f32.mrb[28].mxu1  ;;  %v2658_v1 = vpop.eup %2657  ;;  %v1784_v31 = vld [vmem:[#allocation3 + $0x30] sm:$0xff]  ;;  %v1779_v17 = vld [vmem:[#allocation3 + $0x8] sm:$0xff] }
 0x341   : > { %v1729_v25 = vadd.f32 %v1692_v54, %v1463_v21  ;;  %v2475_v51 = vpop.f32.mrb[29].mxu1  ;;  %1910 = vperm.xlu0 %2516, %v2656_v59   ;;  %1905 = vperm.xlu1 %2517, %v2658_v1   ;;  %v2660_v23 = vpop.eup %2659  ;;  %v1783_v54 = vld [vmem:[#allocation3 + $0x28] sm:$0xff] }
 0x342   : > { %1316 = vst.msk [vmem:[#allocation3 + $0x38] sm:$0xff] %vm366_vm2, %v1295_v12  ;;  %v1695_v30 = vpop.f32.mrb[30].mxu1 }
 0x343   : > { %1749 = vst.msk [vmem:[#allocation4 + $0x70] sm:$0xff] %vm407_vm0, %v1729_v25  ;;  %v1730_v29 = vadd.f32 %v1695_v30, %v1464_v56  ;;  %v2476_v38 = vpop.f32.mrb[31].mxu1  ;;  %v1287_v13 = vpop.xlane.xlu0 %1286 }
 0x344   : > { %v1307_v53 = vadd.f32 %v1287_v13, %v1227_v6  ;;  %v2662_v5 = vpop.eup %2661  ;;  %v1197_v38 = vld [vmem:[#allocation3 + $0x48] sm:$0xff] }
 0x345   : > { %1750 = vst.msk [vmem:[#allocation4 + $0x78] sm:$0xff] %vm407_vm0, %v1730_v29  ;;  %1920 = vperm.xlu0 %2516, %v2660_v23   ;;  %v1795_v16 = vld [vmem:[#allocation3 + $0x88] sm:$0xff] }
 0x346   : > { %1328 = vst.msk [vmem:[#allocation3 + $0x98] sm:$0xff] %vm366_vm2, %v1307_v53  ;;  %2665 = vrcp.f32 %v1795_v16  ;;  %v1196_v16 = vld [vmem:[#allocation3 + $0x40] sm:$0xff] }
 0x348   : > { %v2664_v0 = vpop.eup %2663  ;;  %v1700_v26 = vpop.f32.mrb[32].mxu1 }
 0x349   : > { %v1731_v8 = vadd.f32 %v1700_v26, %v1465_v9  ;;  %v2479_v50 = vpop.f32.mrb[33].mxu1  ;;  %1930 = vperm.xlu0 %2516, %v2662_v5   ;;  %1915 = vperm.xlu1 %2517, %v2664_v0   ;;  %v1785_v30 = vld [vmem:[#allocation3 + $0x38] sm:$0xff] }
 0x34a   : > { %v1703_v27 = vpop.f32.mrb[34].mxu1  ;;  %v1348_v0 = vld [vmem:[#allocation4 + $0x98] sm:$0xff] }
 0x34b   : > { %1751 = vst.msk [vmem:[#allocation4 + $0x80] sm:$0xff] %vm407_vm0, %v1731_v8  ;;  %v1732_v34 = vadd.f32 %v1703_v27, %v1466_v28  ;;  %v2480_v22 = vpop.f32.mrb[35].mxu1  ;;  %v1442_v15 = vpop.permute.xlu0 %1441 }
 0x34c   : > { %v1467_v19 = vmul.f32 %v1442_v15, %v1347_v45  ;;  %v1829_v45 = vld [vmem:[#allocation4 + $0x58] sm:$0xff]  ;;  %v1828_v15 = vld [vmem:[#allocation4 + $0x50] sm:$0xff] }
 0x34d   : > { %1752 = vst.msk [vmem:[#allocation4 + $0x88] sm:$0xff] %vm407_vm0, %v1732_v34  ;;  %1351 = vperm.xlu0 %2516, %v3472_v40   ;;  %v1797_v63 = vld [vmem:[#allocation3 + $0x98] sm:$0xff] }
 0x34e   : > { %2667 = vrcp.f32 %v1797_v63 }
 0x34f   : > { %2669 = vpow2.f32 %v1004_v35 }
 0x350   : > { %v2666_v61 = vpop.eup %2665  ;;  %v1708_v3 = vpop.f32.mrb[36].mxu1  ;;  %2671 = vrcp.f32 %v1778_v18 }
 0x351   : > { %v1733_v42 = vadd.f32 %v1708_v3, %v1467_v19  ;;  %v2483_v14 = vpop.f32.mrb[37].mxu1  ;;  %1361 = vperm.xlu0 %2516, %v3483_v58   ;;  %1925 = vperm.xlu1 %2517, %v2666_v61   ;;  %2673 = vrcp.f32 %v1780_v10  ;;  %v1782_v58 = vld [vmem:[#allocation3 + $0x20] sm:$0xff] }
 0x352   : > { %v3558_v55 = vpop.f32.mrb[38].mxu1  ;;  %2675 = vrcp.f32 %v1782_v58  ;;  %v1830_v14 = vld [vmem:[#allocation4 + $0x60] sm:$0xff]  ;;  %v1833_v58 = vld [vmem:[#allocation4 + $0x78] sm:$0xff] }
 0x353   : > { %1753 = vst.msk [vmem:[#allocation4 + $0x90] sm:$0xff] %vm407_vm0, %v1733_v42  ;;  %v2484_v40 = vpop.f32.mrb[39].mxu1  ;;  %2677 = vpow2.f32 %v1006_v24 }
 0x354   : > { %v3561_v46 = vpop.f32.mrb[20].mxu0  ;;  %2679 = vrcp.f32 %v1784_v31 }
 0x355   : > { %1371 = vperm.xlu0 %2516, %v3502_v36   ;;  %v2437_v43 = vpop.f32.mrb[21].mxu0  ;;  %2681 = vrcp.f32 %v1779_v17 }
 0x356   : > { %v3564_v39 = vpop.f32.mrb[22].mxu0 }
 0x357   : > { %v2438_v33 = vpop.f32.mrb[23].mxu0 }
 0x358   : > { %v2668_v7 = vpop.eup %2667 }
 0x359   : > { %1381 = vperm.xlu0 %2516, %v3515_v44   ;;  %1935 = vperm.xlu1 %2517, %v2668_v7   ;;  %v2670_v37 = vpop.eup %2669  ;;  %v1832_v7 = vld [vmem:[#allocation4 + $0x70] sm:$0xff] }
 0x35a   : > { %v2672_v44 = vpop.eup %2671  ;;  %v1216_v62 = vmul.f32 %v2670_v37, %v1196_v16 }
 0x35b   : > { %v2674_v11 = vpop.eup %2673 }
 0x35c   : > { %v3567_v4 = vpop.f32.mrb[24].mxu0  ;;  %v2676_v12 = vpop.eup %2675 }
 0x35d   : > { %1391 = vperm.xlu0 %2516, %v2670_v37   ;;  %1356 = vperm.xlu1 %2517, %v3497_v2   ;;  %v2441_v36 = vpop.f32.mrb[25].mxu0  ;;  %v1781_v2 = vld [vmem:[#allocation3 + $0x18] sm:$0xff] }
 0x35e   : > { %v3573_v48 = vpop.f32.mrb[26].mxu0  ;;  %2683 = vrcp.f32 %v1781_v2 }
 0x35f   : > { %v2442_v21 = vpop.f32.mrb[27].mxu0  ;;  %2685 = vrcp.f32 %v1783_v54 }
 0x360   : > { %2687 = vrcp.f32 %v1785_v30  ;;  %v1329_v21 = vld [vmem:[#allocation4] sm:$0xff] }
 0x361   : > { %1840 = vperm.xlu0 %2516, %v2672_v44   ;;  %1366 = vperm.xlu1 %2517, %v3521_v49   ;;  %v2678_v49 = vpop.eup %2677 }
 0x362   : > { %v2680_v1 = vpop.eup %2679 }
 0x363   : > { %v2682_v6 = vpop.eup %2681 }
 0x364   : > { %v3576_v59 = vpop.f32.mrb[28].mxu0 }
 0x365   : > { %1850 = vperm.xlu0 %2516, %v2674_v11   ;;  %1376 = vperm.xlu1 %2517, %v3533_v60   ;;  %v2445_v20 = vpop.f32.mrb[29].mxu0 }
 0x366   : > { %v3579_v32 = vpop.f32.mrb[30].mxu0 }
 0x367   : > { %v2446_v57 = vpop.f32.mrb[31].mxu0 }
 0x368   : > { %v2684_v29 = vpop.eup %2683 }
 0x369   : > { %1860 = vperm.xlu0 %2516, %v2676_v12   ;;  %1386 = vperm.xlu1 %2517, %v3539_v41   ;;  %v1217_v41 = vmul.f32 %v2678_v49, %v1197_v38  ;;  %v2686_v13 = vpop.eup %2685 }
 0x36a   : > { %v2688_v53 = vpop.eup %2687 }
 0x36c   : > { %v3582_v56 = vpop.f32.mrb[32].mxu0 }
 0x36d   : > { %1870 = vperm.xlu0 %2516, %v2680_v1   ;;  %1396 = vperm.xlu1 %2517, %v2678_v49   ;;  %v2449_v25 = vpop.f32.mrb[33].mxu0  ;;  %v1331_v49 = vld [vmem:[#allocation4 + $0x10] sm:$0xff]  ;;  %v1834_v1 = vld [vmem:[#allocation4 + $0x80] sm:$0xff] }
 0x36e   : > { %v3584_v60 = vpop.f32.mrb[34].mxu0  ;;  %v1835_v25 = vld [vmem:[#allocation4 + $0x88] sm:$0xff] }
 0x36f   : > { %v2450_v51 = vpop.f32.mrb[35].mxu0 }
 0x371   : > { %1845 = vperm.xlu1 %2517, %v2682_v6  }
 0x375   : > { %1855 = vperm.xlu1 %2517, %v2684_v29  }
 0x378   : > { %v1257_v23 = vpop.xlane.xlu0 %1256 }
 0x379   : > { %v1297_v52 = vadd.f32 %v1257_v23, %v1217_v41  ;;  %1865 = vperm.xlu1 %2517, %v2686_v13   ;;  %v1333_v41 = vld [vmem:[#allocation4 + $0x20] sm:$0xff] }
 0x37b   : > { %1318 = vst.msk [vmem:[#allocation3 + $0x48] sm:$0xff] %vm366_vm2, %v1297_v52 }
 0x37d   : > { %1875 = vperm.xlu1 %2517, %v2688_v53  }
 0x382   : > { %v1787_v47 = vld [vmem:[#allocation3 + $0x48] sm:$0xff] }
 0x383   : > { %2689 = vrcp.f32 %v1787_v47  ;;  %v1836_v47 = vld [vmem:[#allocation4 + $0x90] sm:$0xff] }
 0x384   : > { %v1254_v5 = vpop.xlane.xlu1 %1253 }
 0x385   : > { %v1296_v9 = vadd.f32 %v1254_v5, %v1216_v62 }
 0x387   : > { %1317 = vst.msk [vmem:[#allocation3 + $0x40] sm:$0xff] %vm366_vm2, %v1296_v9 }
 0x388   : > { %v1447_v26 = vpop.permute.xlu1 %1446 }
 0x389   : > { %v1468_v28 = vmul.f32 %v1447_v26, %v1348_v0 }
 0x38b   : > { %v1734_v8 = vadd.f32 %v3558_v55, %v1468_v28  ;;  %v1831_v55 = vld [vmem:[#allocation4 + $0x68] sm:$0xff] }
 0x38d   : > { %v2690_v50 = vpop.eup %2689  ;;  %1754 = vst.msk [vmem:[#allocation4 + $0x98] sm:$0xff] %vm407_vm0, %v1734_v8  ;;  %v1330_v8 = vld [vmem:[#allocation4 + $0x8] sm:$0xff] }
 0x38e   : > { %v1786_v27 = vld [vmem:[#allocation3 + $0x40] sm:$0xff]  ;;  %1885 = vperm.xlu1 %2517, %v2690_v50  }
 0x38f   : > { %2691 = vrcp.f32 %v1786_v27 }
 0x394   : > { %v1837_v62 = vld [vmem:[#allocation4 + $0x98] sm:$0xff] }
 0x399   : > { %v2692_v34 = vpop.eup %2691 }
 0x39a   : > { %1880 = vperm.xlu0 %2516, %v2692_v34  }
 0x3ad   : > { %v1896_v22 = vpop.permute.xlu1 %1895 }
 0x3ae   : > { %v1949_v35 = vmul.f32 %v1896_v22, %v1829_v45 }
 0x3b4   : > { %v1891_v63 = vpop.permute.xlu0 %1890 }
 0x3b5   : > { %v1948_v19 = vmul.f32 %v1891_v63, %v1828_v15  ;;  %v1332_v15 = vld [vmem:[#allocation4 + $0x18] sm:$0xff] }
 0x3b7   : > { %v2518_v61 = vpack.i.bf16 %v1949_v35, %v1948_v19 }
 0x3b9   : > { %2519 = vrot.lane.b32.xlu0 %v2518_v61, %s2721_s26 }
 0x3bc   : > { %v1901_v3 = vpop.permute.xlu0 %1900 }
 0x3bd   : > { %v1950_v18 = vmul.f32 %v1901_v3, %v1830_v14  ;;  %v1334_v3 = vld [vmem:[#allocation4 + $0x28] sm:$0xff] }
 0x3c0   : > { %v1911_v42 = vpop.permute.xlu0 %1910  ;;  %v1906_v40 = vpop.permute.xlu1 %1905 }
 0x3c1   : > { %v1951_v43 = vmul.f32 %v1906_v40, %v1831_v55  ;;  %v1952_v36 = vmul.f32 %v1911_v42, %v1832_v7  ;;  %v1336_v55 = vld [vmem:[#allocation4 + $0x38] sm:$0xff] }
 0x3c3   : > { %v2523_v33 = vpack.i.bf16 %v1951_v43, %v1950_v18  ;;  %v1338_v43 = vld [vmem:[#allocation4 + $0x48] sm:$0xff] }
 0x3c4   : > { %v1921_v10 = vpop.permute.xlu0 %1920 }
 0x3c5   : > { %2524 = vrot.lane.b32.xlu1 %v2523_v33, %s2721_s26  ;;  %v1954_v6 = vmul.f32 %v1921_v10, %v1834_v1 }
 0x3c8   : > { %v1916_v37 = vpop.permute.xlu1 %1915  ;;  %v1931_v24 = vpop.permute.xlu0 %1930 }
 0x3c9   : > { %v1953_v31 = vmul.f32 %v1916_v37, %v1833_v58  ;;  %v1956_v0 = vmul.f32 %v1931_v24, %v1836_v47 }
 0x3cb   : > { %v2528_v44 = vpack.i.bf16 %v1953_v31, %v1952_v36  ;;  %v1590_v17 = vpop.f32.mrb[36].mxu0 }
 0x3cc   : > { %v1352_v11 = vpop.permute.xlu0 %1351  ;;  %v2453_v20 = vpop.f32.mrb[37].mxu0 }
 0x3cd   : > { %v1449_v57 = vmul.f32 %v1352_v11, %v1329_v21  ;;  %2529 = vrot.lane.b32.xlu0 %v2528_v44, %s2721_s26  ;;  %v1593_v2 = vpop.f32.mrb[38].mxu0 }
 0x3ce   : > { %v2454_v12 = vpop.f32.mrb[39].mxu0 }
 0x3cf   : > { %v1715_v54 = vadd.f32 %v3561_v46, %v1449_v57  ;;  %v1335_v46 = vld [vmem:[#allocation4 + $0x30] sm:$0xff] }
 0x3d0   : > { %v1926_v51 = vpop.permute.xlu1 %1925  ;;  %v1362_v30 = vpop.permute.xlu0 %1361 }
 0x3d1   : > { %1735 = vst.msk [vmem:[#allocation4] sm:$0xff] %vm407_vm0, %v1715_v54  ;;  %v1955_v29 = vmul.f32 %v1926_v51, %v1835_v25  ;;  %v1451_v38 = vmul.f32 %v1362_v30, %v1331_v49 }
 0x3d3   : > { %v2533_v13 = vpack.i.bf16 %v1955_v29, %v1954_v6  ;;  %v1717_v23 = vadd.f32 %v3567_v4, %v1451_v38  ;;  %v1337_v4 = vld [vmem:[#allocation4 + $0x40] sm:$0xff] }
 0x3d4   : > { %v1372_v52 = vpop.permute.xlu0 %1371 }
 0x3d5   : > { %1737 = vst.msk [vmem:[#allocation4 + $0x10] sm:$0xff] %vm407_vm0, %v1717_v23  ;;  %v1453_v53 = vmul.f32 %v1372_v52, %v1333_v41  ;;  %2534 = vrot.lane.b32.xlu1 %v2533_v13, %s2721_s26 }
 0x3d7   : > { %v1719_v16 = vadd.f32 %v3576_v59, %v1453_v53 }
 0x3d8   : > { %v1936_v5 = vpop.permute.xlu1 %1935  ;;  %v1382_v9 = vpop.permute.xlu0 %1381 }
 0x3d9   : > { %1739 = vst.msk [vmem:[#allocation4 + $0x20] sm:$0xff] %vm407_vm0, %v1719_v16  ;;  %v1957_v26 = vmul.f32 %v1936_v5, %v1837_v62  ;;  %v1455_v28 = vmul.f32 %v1382_v9, %v1335_v46 }
 0x3db   : > { %v2538_v50 = vpack.i.bf16 %v1957_v26, %v1956_v0  ;;  %v1721_v27 = vadd.f32 %v3582_v56, %v1455_v28 }
 0x3dc   : > { %v1357_v34 = vpop.permute.xlu1 %1356  ;;  %v1392_v22 = vpop.permute.xlu0 %1391  ;;  %v1820_v30 = vld [vmem:[#allocation4 + $0x10] sm:$0xff] }
 0x3dd   : > { %1741 = vst.msk [vmem:[#allocation4 + $0x30] sm:$0xff] %vm407_vm0, %v1721_v27  ;;  %v1450_v45 = vmul.f32 %v1357_v34, %v1330_v8  ;;  %v1457_v59 = vmul.f32 %v1392_v22, %v1337_v4  ;;  %2539 = vrot.lane.b32.xlu0 %v2538_v50, %s2721_s26 }
 0x3df   : > { %v1716_v63 = vadd.f32 %v3564_v39, %v1450_v45  ;;  %v1723_v35 = vadd.f32 %v1590_v17, %v1457_v59  ;;  %v1818_v17 = vld [vmem:[#allocation4] sm:$0xff] }
 0x3e0   : > { %v1367_v19 = vpop.permute.xlu1 %1366  ;;  %v1841_v58 = vpop.permute.xlu0 %1840  ;;  %v1822_v16 = vld [vmem:[#allocation4 + $0x20] sm:$0xff] }
 0x3e1   : > { %1736 = vst.msk [vmem:[#allocation4 + $0x8] sm:$0xff] %vm407_vm0, %v1716_v63  ;;  %1743 = vst.msk [vmem:[#allocation4 + $0x40] sm:$0xff] %vm407_vm0, %v1723_v35  ;;  %v1452_v61 = vmul.f32 %v1367_v19, %v1332_v15 }
 0x3e3   : > { %v1718_v56 = vadd.f32 %v3573_v48, %v1452_v61 }
 0x3e4   : > { %v1377_v42 = vpop.permute.xlu1 %1376  ;;  %v1851_v37 = vpop.permute.xlu0 %1850  ;;  %v1824_v50 = vld [vmem:[#allocation4 + $0x30] sm:$0xff] }
 0x3e5   : > { %1738 = vst.msk [vmem:[#allocation4 + $0x18] sm:$0xff] %vm407_vm0, %v1718_v56  ;;  %v1454_v14 = vmul.f32 %v1377_v42, %v1334_v3  ;;  %v1940_v38 = vmul.f32 %v1851_v37, %v1820_v30 }
 0x3e7   : > { %v1720_v40 = vadd.f32 %v3579_v32, %v1454_v14 }
 0x3e8   : > { %v1387_v18 = vpop.permute.xlu1 %1386  ;;  %v1861_v24 = vpop.permute.xlu0 %1860  ;;  %v1819_v11 = vld [vmem:[#allocation4 + $0x8] sm:$0xff]  ;;  %v1826_v3 = vld [vmem:[#allocation4 + $0x40] sm:$0xff] }
 0x3e9   : > { %1740 = vst.msk [vmem:[#allocation4 + $0x28] sm:$0xff] %vm407_vm0, %v1720_v40  ;;  %v1456_v39 = vmul.f32 %v1387_v18, %v1336_v55  ;;  %v1942_v5 = vmul.f32 %v1861_v24, %v1822_v16 }
 0x3eb   : > { %v1722_v33 = vadd.f32 %v3584_v60, %v1456_v39  ;;  %v1938_v60 = vmul.f32 %v1841_v58, %v1818_v17 }
 0x3ec   : > { %v1397_v10 = vpop.permute.xlu1 %1396  ;;  %v1871_v32 = vpop.permute.xlu0 %1870  ;;  %v1821_v6 = vld [vmem:[#allocation4 + $0x18] sm:$0xff] }
 0x3ed   : > { %1742 = vst.msk [vmem:[#allocation4 + $0x38] sm:$0xff] %vm407_vm0, %v1722_v33  ;;  %v1458_v7 = vmul.f32 %v1397_v10, %v1338_v43  ;;  %v1944_v22 = vmul.f32 %v1871_v32, %v1824_v50 }
 0x3ef   : > { %v1724_v48 = vadd.f32 %v1593_v2, %v1458_v7 }
 0x3f0   : > { %v1846_v36 = vpop.permute.xlu1 %1845  ;;  %v1823_v47 = vld [vmem:[#allocation4 + $0x28] sm:$0xff] }
 0x3f1   : > { %1744 = vst.msk [vmem:[#allocation4 + $0x48] sm:$0xff] %vm407_vm0, %v1724_v48  ;;  %v1939_v57 = vmul.f32 %v1846_v36, %v1819_v11 }
 0x3f4   : > { %v1856_v31 = vpop.permute.xlu1 %1855  ;;  %v1825_v27 = vld [vmem:[#allocation4 + $0x38] sm:$0xff] }
 0x3f5   : > { %v1941_v41 = vmul.f32 %v1856_v31, %v1821_v6 }
 0x3f8   : > { %v1866_v44 = vpop.permute.xlu1 %1865  ;;  %v1827_v61 = vld [vmem:[#allocation4 + $0x48] sm:$0xff] }
 0x3f9   : > { %v1943_v9 = vmul.f32 %v1866_v44, %v1823_v47 }
 0x3fc   : > { %v1876_v25 = vpop.permute.xlu1 %1875 }
 0x3fd   : > { %v1945_v45 = vmul.f32 %v1876_v25, %v1825_v27 }
 0x40d   : > { %v1886_v51 = vpop.permute.xlu1 %1885 }
 0x40e   : > { %v1947_v42 = vmul.f32 %v1886_v51, %v1827_v61 }
 0x419   : > { %v1881_v21 = vpop.permute.xlu0 %1880 }
 0x41a   : > { %v1946_v14 = vmul.f32 %v1881_v21, %v1826_v3 }
 0x42b   : > { %v2520_v20 = vpop.permute.xlu0 %2519 }
 0x42c   : > { %v2522_v12 = vunpack.i.h.bf16 %v2520_v20  ;;  %v2521_v49 = vunpack.i.l.bf16 %v2520_v20 }
 0x42e   : > { %v1998_v2 = vsel %vm407_vm0, %v1938_v60, %v2521_v49  ;;  %v1999_v54 = vsel %vm407_vm0, %v1939_v57, %v2522_v12 }
 0x42f   : > { %v2299_v1 = vpack.c.bf16 %v1999_v54, %v1998_v2 }
 0x431   : > { %2300 = vst [vmem:[%s3617_s30] sm:$0xff] %v2299_v1  }
 0x437   : > { %v2525_v29 = vpop.permute.xlu1 %2524 }
 0x438   : > { %v2527_v13 = vunpack.i.h.bf16 %v2525_v29  ;;  %v2526_v23 = vunpack.i.l.bf16 %v2525_v29 }
 0x43a   : > { %v2000_v52 = vsel %vm407_vm0, %v1940_v38, %v2526_v23  ;;  %v2001_v53 = vsel %vm407_vm0, %v1941_v41, %v2527_v13 }
 0x43b   : > { %v2304_v46 = vpack.c.bf16 %v2001_v53, %v2000_v52 }
 0x43d   : > { %2321 = vst [vmem:[%s3617_s30 + $0x8] sm:$0xff] %v2304_v46  }
 0x43f   : > { %v2530_v62 = vpop.permute.xlu0 %2529 }
 0x440   : > { %v2532_v0 = vunpack.i.h.bf16 %v2530_v62  ;;  %v2531_v26 = vunpack.i.l.bf16 %v2530_v62 }
 0x442   : > { %v2002_v28 = vsel %vm407_vm0, %v1942_v5, %v2531_v26  ;;  %v2003_v8 = vsel %vm407_vm0, %v1943_v9, %v2532_v0 }
 0x443   : > { %v2309_v4 = vpack.c.bf16 %v2003_v8, %v2002_v28 }
 0x445   : > { %2322 = vst [vmem:[%s3617_s30 + $0x10] sm:$0xff] %v2309_v4  }
 0x447   : > { %v2535_v34 = vpop.permute.xlu1 %2534 }
 0x448   : > { %v2537_v59 = vunpack.i.h.bf16 %v2535_v34  ;;  %v2536_v15 = vunpack.i.l.bf16 %v2535_v34 }
 0x44a   : > { %v2004_v63 = vsel %vm407_vm0, %v1944_v22, %v2536_v15  ;;  %v2005_v35 = vsel %vm407_vm0, %v1945_v45, %v2537_v59 }
 0x44b   : > { %v2314_v19 = vpack.c.bf16 %v2005_v35, %v2004_v63 }
 0x44d   : > { %2323 = vst [vmem:[%s3617_s30 + $0x18] sm:$0xff] %v2314_v19  }
 0x44f   : > { %v2540_v56 = vpop.permute.xlu0 %2539 }
 0x450   : > { %v2542_v55 = vunpack.i.h.bf16 %v2540_v56  ;;  %v2541_v40 = vunpack.i.l.bf16 %v2540_v56 }
 0x452   : > { %v2006_v18 = vsel %vm407_vm0, %v1946_v14, %v2541_v40  ;;  %v2007_v39 = vsel %vm407_vm0, %v1947_v42, %v2542_v55 }
 0x453   : > { %v2319_v43 = vpack.c.bf16 %v2007_v39, %v2006_v18 }
 0x455   : > { %2324 = vst [vmem:[%s3617_s30 + $0x20] sm:$0xff] %v2319_v43  }
 0x456 PF: > { %s13_s14 = sadd.s32 1, %s2715_s14   ;;  %s3679_s12 = smov %s2711_s13 }
 0x457   : > { %p10_p5 = scmp.ge.s32.totalorder %s13_s14, 4   ;;  %s3680_s13 = smov %s3682_s15 }
 0x459   :  { %12 = sbr.rel (!%p10_p5) target bundleno = 2 (0x2), region = 84 }

</bundles_post_ra>
